<compile_context>
chip_gen: v7x
topology: tpu7x:2x2x1
jax: 0.10.0
libtpu: 0.0.40
codegen_flags: <defaults>
</compile_context>

<pallas_src>
import functools

import jax
import jax.numpy as jnp
from jax.experimental import pallas as pl
from jax.experimental.pallas import tpu as pltpu

IN_FEATURES = 2      # input_keys  = ['x', 'y']
OUT_FEATURES = 3     # output_keys = ['u', 'v', 'p']
NR_LAYERS = 6
LAYER_SIZE = 80
LANE = 128           # padded hidden width (sublanes of the transposed activations)
IN_PAD = 8           # padded input-feature rows (K of the layer-0 MXU matmul)
OUT_PAD = 8          # padded output-feature rows (sublanes of the stored output)


def _round_up(v, m):
    return ((v + m - 1) // m) * m


# ---------------------------------------------------------------------------
# Pallas kernel: full MLP forward for one tile of rows, transposed layout.
#   refs = (w0, b0, w1, b1, ..., w6, b6, out_ref)
#   w0: [128, 8], w1..w5: [128, 128], w6: [8, 128]; biases: [rows, 1]
#   xt_ref: [8, tr]   out_ref: [8, tr]   (rows of the batch are on the lane axis)
# ---------------------------------------------------------------------------
def mlp_kernel(xt_ref, *refs, use_bf16=False):
    out_ref = refs[-1]
    wb = refs[:-1]
    n_linears = len(wb) // 2

    # Layer 0: [128, 8] x [8, tr] MXU matmul (K zero-padded 2 -> 8).
    xt = xt_ref[...].astype(jnp.float32)                           # [8, tr]
    w0 = wb[0][...].astype(jnp.float32)                            # [128, 8]
    b0 = wb[1][...].astype(jnp.float32)                            # [128, 1]
    h = jnp.tanh(jnp.dot(w0, xt, preferred_element_type=jnp.float32) + b0)
    if use_bf16:
        h = h.astype(jnp.bfloat16)                                 # bf16 through tanh

    # Hidden layers 1..5 (tanh) and output layer 6 (plain linear, only 8 real rows),
    # all on the MXU with f32 accumulation; biases stay f32.
    for li in range(1, n_linears):
        w = wb[2 * li][...]                                        # [128,128] / [8,128]
        b = wb[2 * li + 1][...].astype(jnp.float32)                # [128,1]  / [8,1]
        acc = jnp.dot(w, h, preferred_element_type=jnp.float32) + b
        if li < n_linears - 1:
            # bf16 tanh keeps the single-slot EUP fed with packed operands (v6e/v7x).
            h = jnp.tanh(acc.astype(jnp.bfloat16)) if use_bf16 else jnp.tanh(acc)
        else:
            h = acc                                                # [8, tr] f32

    out_ref[...] = h.astype(out_ref.dtype)


# ---------------------------------------------------------------------------
# Wrapper: lane-tile batch rows, resident (constant-index) weights, zero padding.
# ---------------------------------------------------------------------------
def mlp_forward(x, weights, biases, *, tile_rows=4096, use_bf16=False):
    n, f_in = x.shape
    n_linears = len(weights)
    out_features = weights[-1].shape[1]

    # --- parameters: transpose + zero-pad into the kernel's [rows, cols] layout ---
    # Zero-padded weight rows/cols + zero biases keep padded features exactly zero
    # through tanh, so the real 80/3 features are bit-identical to the unpadded net.
    wt_list, bt_list = [], []
    for li, (w, b) in enumerate(zip(weights, biases)):
        fin, fout = w.shape
        if li == 0:
            rows, cols = LANE, IN_PAD            # [128, 8]
        elif li == n_linears - 1:
            rows, cols = OUT_PAD, LANE           # [8, 128]
        else:
            rows, cols = LANE, LANE              # [128, 128]
        wt = jnp.zeros((rows, cols), jnp.float32).at[:fout, :fin].set(
            w.T.astype(jnp.float32))
        bt = jnp.zeros((rows, 1), jnp.float32).at[:fout, 0].set(
            b.reshape(-1).astype(jnp.float32))
        if use_bf16 and li > 0:
            wt = wt.astype(jnp.bfloat16)         # MXU operands only; biases stay f32
        wt_list.append(wt)
        bt_list.append(bt)

    # --- row tiling: rows live on the lane axis, so tiles are multiples of 128 ---
    n128 = _round_up(max(n, 1), LANE)
    tr = min(_round_up(max(int(tile_rows), LANE), LANE), n128)
    if tr >= n128 and n128 >= 2 * LANE:
        # Split so the grid has >= 2 iterations: shards across both v7x TensorCores
        # via "parallel" semantics; harmless on single-TC v5e/v6e.
        tr = _round_up(-(-n128 // 2), LANE)
    n_pad = _round_up(n, tr)
    grid = n_pad // tr

    xt = jnp.zeros((IN_PAD, n_pad), jnp.float32).at[:f_in, :n].set(
        x.T.astype(jnp.float32))

    in_specs = [pl.BlockSpec((IN_PAD, tr), lambda i: (0, i))]
    args = [xt]
    for wt, bt in zip(wt_list, bt_list):
        # Constant index_map -> weights/biases stay resident in VMEM (~340 KB f32,
        # ~680 KB double-buffered; ~half that in bf16).
        in_specs.append(pl.BlockSpec(wt.shape, lambda i: (0, 0)))
        in_specs.append(pl.BlockSpec(bt.shape, lambda i: (0, 0)))
        args.extend([wt, bt])

    # Compute-bound cost hint for XLA's scheduler.
    per_row_flops = 2 * sum(int(wt.shape[0]) * int(wt.shape[1]) for wt in wt_list)
    flops = n_pad * per_row_flops
    transcendentals = n_pad * LANE * (n_linears - 1)
    param_bytes = sum(int(a.size) * a.dtype.itemsize for a in (wt_list + bt_list))
    bytes_accessed = n_pad * (IN_PAD + OUT_PAD) * 4 + int(param_bytes)

    out_t = pl.pallas_call(
        functools.partial(mlp_kernel, use_bf16=use_bf16),
        out_shape=jax.ShapeDtypeStruct((OUT_PAD, n_pad), jnp.float32),
        grid_spec=pltpu.PrefetchScalarGridSpec(
            num_scalar_prefetch=0,
            grid=(grid,),
            in_specs=in_specs,
            out_specs=pl.BlockSpec((OUT_PAD, tr), lambda i: (0, i)),
        ),
        compiler_params=pltpu.CompilerParams(
            dimension_semantics=("parallel",)),
        cost_estimate=pl.CostEstimate(
            flops=flops,
            transcendentals=transcendentals,
            bytes_accessed=bytes_accessed),
    )(*args)

    # Back to [N, out_features] (tiny XLA transpose of a [3, n] slab).
    return out_t[:out_features, :n].T


# ---------------------------------------------------------------------------
# Deterministic parameter construction (synthetic init, weight-norm applied).
# ---------------------------------------------------------------------------
def apply_weight_norm(v, g):
    # v: [out, in] (PyTorch Linear convention), g: [out]
    norm = jnp.sqrt(jnp.sum(v * v, axis=1, keepdims=True))
    w_eff = g[:, None] * v / norm        # [out, in]
    return w_eff.T                        # [in, out] for x @ W


def init_params(key):
    # layer dims: (2->80), (80->80) x 5, (80->3)
    dims = [(IN_FEATURES, LAYER_SIZE)] + \
           [(LAYER_SIZE, LAYER_SIZE)] * (NR_LAYERS - 1) + \
           [(LAYER_SIZE, OUT_FEATURES)]
    weights, biases = [], []
    for li, (fin, fout) in enumerate(dims):
        key, kv, kg, kb = jax.random.split(key, 4)
        v = jax.random.normal(kv, (fout, fin), jnp.float32) * (1.0 / jnp.sqrt(fin))
        b = jax.random.normal(kb, (1, fout), jnp.float32) * 0.01
        if li < NR_LAYERS:   # weight-normed hidden layers
            g = 1.0 + 0.1 * jax.random.normal(kg, (fout,), jnp.float32)
            w = apply_weight_norm(v, g)
        else:                # final plain Linear
            w = v.T
        weights.append(w)
        biases.append(b)
    return weights, biases


def physicsnemo_net_forward(input_dict, weights, biases,
                            input_keys=("x", "y"), output_keys=("u", "v", "p"),
                            tile_rows=4096, use_bf16=False):
    x = jnp.concatenate([input_dict[k] for k in input_keys], axis=-1)   # [N, 2]
    out = mlp_forward(x, weights, biases, tile_rows=tile_rows,
                      use_bf16=use_bf16)                                 # [N, 3]
    return {k: out[:, i:i + 1] for i, k in enumerate(output_keys)}


# Pure-JAX reference for verification.
def reference_forward(x, weights, biases):
    h = x
    for li, (w, b) in enumerate(zip(weights, biases)):
        h = h @ w + b
        if li < len(weights) - 1:
            h = jnp.tanh(h)
    return h


if __name__ == "__main__":
    key = jax.random.PRNGKey(0)
    kparams, kx, ky, kx2, kx3 = jax.random.split(key, 5)

    weights, biases = init_params(kparams)

    # ---- small dict-interface test (single 128-row tile, heavy row padding) ----
    N = 8
    input_dict = {
        "x": jax.random.uniform(kx, (N, 1), jnp.float32),
        "y": jax.random.uniform(ky, (N, 1), jnp.float32),
    }
    out_dict = physicsnemo_net_forward(input_dict, weights, biases)
    jax.block_until_ready(out_dict)

    x_cat = jnp.concatenate([input_dict["x"], input_dict["y"]], axis=-1)
    ref = reference_forward(x_cat, weights, biases)
    got = jnp.concatenate([out_dict["u"], out_dict["v"], out_dict["p"]], axis=-1)
    assert got.shape == (N, 3)
    assert jnp.allclose(got, ref, atol=1e-4, rtol=1e-4)

    # ---- multi-tile grid test (explicit small tile, grid >= 2, row padding) ----
    N2 = 200
    x2 = jax.random.uniform(kx2, (N2, IN_FEATURES), jnp.float32)
    out2 = mlp_forward(x2, weights, biases, tile_rows=256)
    jax.block_until_ready(out2)
    ref2 = reference_forward(x2, weights, biases)
    assert out2.shape == (N2, OUT_FEATURES)
    assert jnp.allclose(out2, ref2, atol=1e-4, rtol=1e-4)

    # ---- default tile_rows path (clamp + >=2-grid-step split for v7x) ----
    N3 = 1000
    x3 = jax.random.uniform(kx3, (N3, IN_FEATURES), jnp.float32)
    out3 = mlp_forward(x3, weights, biases)
    jax.block_until_ready(out3)
    ref3 = reference_forward(x3, weights, biases)
    assert out3.shape == (N3, OUT_FEATURES)
    assert jnp.allclose(out3, ref3, atol=1e-4, rtol=1e-4)

    # ---- opt-in bf16 path (bf16 MXU operands + bf16 tanh, f32 accumulation) ----
    out4 = mlp_forward(x3, weights, biases, use_bf16=True)
    jax.block_until_ready(out4)
    assert bool(jnp.all(jnp.isfinite(out4)))
    assert float(jnp.max(jnp.abs(out4 - ref3))) < 0.25

    print("KERNEL_OK")
</pallas_src>

<mosaic_0001>
module attributes {stable_mosaic.version = 11 : i64} {
  func.func @mlp_kernel(%arg0: i32, %arg1: memref<8x128xf32, #tpu.memory_space<vmem>>, %arg2: memref<128x8xf32, #tpu.memory_space<vmem>>, %arg3: memref<128x1xf32, #tpu.memory_space<vmem>>, %arg4: memref<128x128xf32, #tpu.memory_space<vmem>>, %arg5: memref<128x1xf32, #tpu.memory_space<vmem>>, %arg6: memref<128x128xf32, #tpu.memory_space<vmem>>, %arg7: memref<128x1xf32, #tpu.memory_space<vmem>>, %arg8: memref<128x128xf32, #tpu.memory_space<vmem>>, %arg9: memref<128x1xf32, #tpu.memory_space<vmem>>, %arg10: memref<128x128xf32, #tpu.memory_space<vmem>>, %arg11: memref<128x1xf32, #tpu.memory_space<vmem>>, %arg12: memref<128x128xf32, #tpu.memory_space<vmem>>, %arg13: memref<128x1xf32, #tpu.memory_space<vmem>>, %arg14: memref<8x128xf32, #tpu.memory_space<vmem>>, %arg15: memref<8x1xf32, #tpu.memory_space<vmem>>, %arg16: memref<8x128xf32, #tpu.memory_space<vmem>>) attributes {dimension_semantics = [#tpu.dimension_semantics<parallel>], iteration_bounds = array<i64: 1>, scalar_prefetch = 0 : i64, scratch_operands = 0 : i64, tpu.core_type = #tpu.core_type<tc>, window_params = [{transform_indices = @transform_0, window_bounds = array<i64: 8, 128>}, {pipeline_mode = #tpu.pipeline_mode<synchronous>, transform_indices = @transform_1, window_bounds = array<i64: 128, 8>}, {pipeline_mode = #tpu.pipeline_mode<synchronous>, transform_indices = @transform_2, window_bounds = array<i64: 128, 1>}, {pipeline_mode = #tpu.pipeline_mode<synchronous>, transform_indices = @transform_3, window_bounds = array<i64: 128, 128>}, {pipeline_mode = #tpu.pipeline_mode<synchronous>, transform_indices = @transform_4, window_bounds = array<i64: 128, 1>}, {pipeline_mode = #tpu.pipeline_mode<synchronous>, transform_indices = @transform_5, window_bounds = array<i64: 128, 128>}, {pipeline_mode = #tpu.pipeline_mode<synchronous>, transform_indices = @transform_6, window_bounds = array<i64: 128, 1>}, {pipeline_mode = #tpu.pipeline_mode<synchronous>, transform_indices = @transform_7, window_bounds = array<i64: 128, 128>}, {pipeline_mode = #tpu.pipeline_mode<synchronous>, transform_indices = @transform_8, window_bounds = array<i64: 128, 1>}, {pipeline_mode = #tpu.pipeline_mode<synchronous>, transform_indices = @transform_9, window_bounds = array<i64: 128, 128>}, {pipeline_mode = #tpu.pipeline_mode<synchronous>, transform_indices = @transform_10, window_bounds = array<i64: 128, 1>}, {pipeline_mode = #tpu.pipeline_mode<synchronous>, transform_indices = @transform_11, window_bounds = array<i64: 128, 128>}, {pipeline_mode = #tpu.pipeline_mode<synchronous>, transform_indices = @transform_12, window_bounds = array<i64: 128, 1>}, {pipeline_mode = #tpu.pipeline_mode<synchronous>, transform_indices = @transform_13, window_bounds = array<i64: 8, 128>}, {pipeline_mode = #tpu.pipeline_mode<synchronous>, transform_indices = @transform_14, window_bounds = array<i64: 8, 1>}, {transform_indices = @transform_15, window_bounds = array<i64: 8, 128>}]} {
    %c0 = arith.constant 0 : index
    %c0_0 = arith.constant 0 : index
    %0 = vector.load %arg1[%c0, %c0_0] : memref<8x128xf32, #tpu.memory_space<vmem>>, vector<8x128xf32>
    %c0_1 = arith.constant 0 : index
    %c0_2 = arith.constant 0 : index
    %1 = vector.load %arg2[%c0_1, %c0_2] : memref<128x8xf32, #tpu.memory_space<vmem>>, vector<128x8xf32>
    %c0_3 = arith.constant 0 : index
    %c0_4 = arith.constant 0 : index
    %2 = vector.load %arg3[%c0_3, %c0_4] : memref<128x1xf32, #tpu.memory_space<vmem>>, vector<128x1xf32>
    %cst = arith.constant dense<0.000000e+00> : vector<128x128xf32>
    %3 = tpu.matmul %1, %0, %cst {dimension_numbers = #tpu.dot_dimension_numbers<[1], [0], [0], [1], [0, 0, 1, 1], [], []>} : vector<128x8xf32>, vector<8x128xf32>, vector<128x128xf32> -> vector<128x128xf32>
    %4 = vector.broadcast %2 : vector<128x1xf32> to vector<128x128xf32>
    %5 = arith.addf %3, %4 : vector<128x128xf32>
    %6 = math.tanh %5 : vector<128x128xf32>
    %c0_5 = arith.constant 0 : index
    %c0_6 = arith.constant 0 : index
    %7 = vector.load %arg4[%c0_5, %c0_6] : memref<128x128xf32, #tpu.memory_space<vmem>>, vector<128x128xf32>
    %c0_7 = arith.constant 0 : index
    %c0_8 = arith.constant 0 : index
    %8 = vector.load %arg5[%c0_7, %c0_8] : memref<128x1xf32, #tpu.memory_space<vmem>>, vector<128x1xf32>
    %cst_9 = arith.constant dense<0.000000e+00> : vector<128x128xf32>
    %9 = tpu.matmul %7, %6, %cst_9 {dimension_numbers = #tpu.dot_dimension_numbers<[1], [0], [0], [1], [0, 0, 1, 1], [], []>} : vector<128x128xf32>, vector<128x128xf32>, vector<128x128xf32> -> vector<128x128xf32>
    %10 = vector.broadcast %8 : vector<128x1xf32> to vector<128x128xf32>
    %11 = arith.addf %9, %10 : vector<128x128xf32>
    %12 = math.tanh %11 : vector<128x128xf32>
    %c0_10 = arith.constant 0 : index
    %c0_11 = arith.constant 0 : index
    %13 = vector.load %arg6[%c0_10, %c0_11] : memref<128x128xf32, #tpu.memory_space<vmem>>, vector<128x128xf32>
    %c0_12 = arith.constant 0 : index
    %c0_13 = arith.constant 0 : index
    %14 = vector.load %arg7[%c0_12, %c0_13] : memref<128x1xf32, #tpu.memory_space<vmem>>, vector<128x1xf32>
    %cst_14 = arith.constant dense<0.000000e+00> : vector<128x128xf32>
    %15 = tpu.matmul %13, %12, %cst_14 {dimension_numbers = #tpu.dot_dimension_numbers<[1], [0], [0], [1], [0, 0, 1, 1], [], []>} : vector<128x128xf32>, vector<128x128xf32>, vector<128x128xf32> -> vector<128x128xf32>
    %16 = vector.broadcast %14 : vector<128x1xf32> to vector<128x128xf32>
    %17 = arith.addf %15, %16 : vector<128x128xf32>
    %18 = math.tanh %17 : vector<128x128xf32>
    %c0_15 = arith.constant 0 : index
    %c0_16 = arith.constant 0 : index
    %19 = vector.load %arg8[%c0_15, %c0_16] : memref<128x128xf32, #tpu.memory_space<vmem>>, vector<128x128xf32>
    %c0_17 = arith.constant 0 : index
    %c0_18 = arith.constant 0 : index
    %20 = vector.load %arg9[%c0_17, %c0_18] : memref<128x1xf32, #tpu.memory_space<vmem>>, vector<128x1xf32>
    %cst_19 = arith.constant dense<0.000000e+00> : vector<128x128xf32>
    %21 = tpu.matmul %19, %18, %cst_19 {dimension_numbers = #tpu.dot_dimension_numbers<[1], [0], [0], [1], [0, 0, 1, 1], [], []>} : vector<128x128xf32>, vector<128x128xf32>, vector<128x128xf32> -> vector<128x128xf32>
    %22 = vector.broadcast %20 : vector<128x1xf32> to vector<128x128xf32>
    %23 = arith.addf %21, %22 : vector<128x128xf32>
    %24 = math.tanh %23 : vector<128x128xf32>
    %c0_20 = arith.constant 0 : index
    %c0_21 = arith.constant 0 : index
    %25 = vector.load %arg10[%c0_20, %c0_21] : memref<128x128xf32, #tpu.memory_space<vmem>>, vector<128x128xf32>
    %c0_22 = arith.constant 0 : index
    %c0_23 = arith.constant 0 : index
    %26 = vector.load %arg11[%c0_22, %c0_23] : memref<128x1xf32, #tpu.memory_space<vmem>>, vector<128x1xf32>
    %cst_24 = arith.constant dense<0.000000e+00> : vector<128x128xf32>
    %27 = tpu.matmul %25, %24, %cst_24 {dimension_numbers = #tpu.dot_dimension_numbers<[1], [0], [0], [1], [0, 0, 1, 1], [], []>} : vector<128x128xf32>, vector<128x128xf32>, vector<128x128xf32> -> vector<128x128xf32>
    %28 = vector.broadcast %26 : vector<128x1xf32> to vector<128x128xf32>
    %29 = arith.addf %27, %28 : vector<128x128xf32>
    %30 = math.tanh %29 : vector<128x128xf32>
    %c0_25 = arith.constant 0 : index
    %c0_26 = arith.constant 0 : index
    %31 = vector.load %arg12[%c0_25, %c0_26] : memref<128x128xf32, #tpu.memory_space<vmem>>, vector<128x128xf32>
    %c0_27 = arith.constant 0 : index
    %c0_28 = arith.constant 0 : index
    %32 = vector.load %arg13[%c0_27, %c0_28] : memref<128x1xf32, #tpu.memory_space<vmem>>, vector<128x1xf32>
    %cst_29 = arith.constant dense<0.000000e+00> : vector<128x128xf32>
    %33 = tpu.matmul %31, %30, %cst_29 {dimension_numbers = #tpu.dot_dimension_numbers<[1], [0], [0], [1], [0, 0, 1, 1], [], []>} : vector<128x128xf32>, vector<128x128xf32>, vector<128x128xf32> -> vector<128x128xf32>
    %34 = vector.broadcast %32 : vector<128x1xf32> to vector<128x128xf32>
    %35 = arith.addf %33, %34 : vector<128x128xf32>
    %36 = math.tanh %35 : vector<128x128xf32>
    %c0_30 = arith.constant 0 : index
    %c0_31 = arith.constant 0 : index
    %37 = vector.load %arg14[%c0_30, %c0_31] : memref<8x128xf32, #tpu.memory_space<vmem>>, vector<8x128xf32>
    %c0_32 = arith.constant 0 : index
    %c0_33 = arith.constant 0 : index
    %38 = vector.load %arg15[%c0_32, %c0_33] : memref<8x1xf32, #tpu.memory_space<vmem>>, vector<8x1xf32>
    %cst_34 = arith.constant dense<0.000000e+00> : vector<8x128xf32>
    %39 = tpu.matmul %37, %36, %cst_34 {dimension_numbers = #tpu.dot_dimension_numbers<[1], [0], [0], [1], [0, 0, 1, 1], [], []>} : vector<8x128xf32>, vector<128x128xf32>, vector<8x128xf32> -> vector<8x128xf32>
    %40 = vector.broadcast %38 : vector<8x1xf32> to vector<8x128xf32>
    %41 = arith.addf %39, %40 : vector<8x128xf32>
    %c0_35 = arith.constant 0 : index
    %c0_36 = arith.constant 0 : index
    %42 = vector.load %arg16[%c0_35, %c0_36] : memref<8x128xf32, #tpu.memory_space<vmem>>, vector<8x128xf32>
    tpu.vector_store %arg16[%c0_35, %c0_36], %41 {strides = array<i32>} : memref<8x128xf32, #tpu.memory_space<vmem>>, vector<8x128xf32>,
    return
  }
  func.func @transform_0(%arg0: i32) -> (i32, i32) {
    %c0_i32 = arith.constant 0 : i32
    %c0_i32_0 = arith.constant 0 : i32
    return %c0_i32, %arg0 : i32, i32
  }
  func.func @transform_1(%arg0: i32) -> (i32, i32) {
    %c0_i32 = arith.constant 0 : i32
    %c0_i32_0 = arith.constant 0 : i32
    %c0_i32_1 = arith.constant 0 : i32
    return %c0_i32, %c0_i32_0 : i32, i32
  }
  func.func @transform_2(%arg0: i32) -> (i32, i32) {
    %c0_i32 = arith.constant 0 : i32
    %c0_i32_0 = arith.constant 0 : i32
    %c0_i32_1 = arith.constant 0 : i32
    return %c0_i32, %c0_i32_0 : i32, i32
  }
  func.func @transform_3(%arg0: i32) -> (i32, i32) {
    %c0_i32 = arith.constant 0 : i32
    %c0_i32_0 = arith.constant 0 : i32
    %c0_i32_1 = arith.constant 0 : i32
    return %c0_i32, %c0_i32_0 : i32, i32
  }
  func.func @transform_4(%arg0: i32) -> (i32, i32) {
    %c0_i32 = arith.constant 0 : i32
    %c0_i32_0 = arith.constant 0 : i32
    %c0_i32_1 = arith.constant 0 : i32
    return %c0_i32, %c0_i32_0 : i32, i32
  }
  func.func @transform_5(%arg0: i32) -> (i32, i32) {
    %c0_i32 = arith.constant 0 : i32
    %c0_i32_0 = arith.constant 0 : i32
    %c0_i32_1 = arith.constant 0 : i32
    return %c0_i32, %c0_i32_0 : i32, i32
  }
  func.func @transform_6(%arg0: i32) -> (i32, i32) {
    %c0_i32 = arith.constant 0 : i32
    %c0_i32_0 = arith.constant 0 : i32
    %c0_i32_1 = arith.constant 0 : i32
    return %c0_i32, %c0_i32_0 : i32, i32
  }
  func.func @transform_7(%arg0: i32) -> (i32, i32) {
    %c0_i32 = arith.constant 0 : i32
    %c0_i32_0 = arith.constant 0 : i32
    %c0_i32_1 = arith.constant 0 : i32
    return %c0_i32, %c0_i32_0 : i32, i32
  }
  func.func @transform_8(%arg0: i32) -> (i32, i32) {
    %c0_i32 = arith.constant 0 : i32
    %c0_i32_0 = arith.constant 0 : i32
    %c0_i32_1 = arith.constant 0 : i32
    return %c0_i32, %c0_i32_0 : i32, i32
  }
  func.func @transform_9(%arg0: i32) -> (i32, i32) {
    %c0_i32 = arith.constant 0 : i32
    %c0_i32_0 = arith.constant 0 : i32
    %c0_i32_1 = arith.constant 0 : i32
    return %c0_i32, %c0_i32_0 : i32, i32
  }
  func.func @transform_10(%arg0: i32) -> (i32, i32) {
    %c0_i32 = arith.constant 0 : i32
    %c0_i32_0 = arith.constant 0 : i32
    %c0_i32_1 = arith.constant 0 : i32
    return %c0_i32, %c0_i32_0 : i32, i32
  }
  func.func @transform_11(%arg0: i32) -> (i32, i32) {
    %c0_i32 = arith.constant 0 : i32
    %c0_i32_0 = arith.constant 0 : i32
    %c0_i32_1 = arith.constant 0 : i32
    return %c0_i32, %c0_i32_0 : i32, i32
  }
  func.func @transform_12(%arg0: i32) -> (i32, i32) {
    %c0_i32 = arith.constant 0 : i32
    %c0_i32_0 = arith.constant 0 : i32
    %c0_i32_1 = arith.constant 0 : i32
    return %c0_i32, %c0_i32_0 : i32, i32
  }
  func.func @transform_13(%arg0: i32) -> (i32, i32) {
    %c0_i32 = arith.constant 0 : i32
    %c0_i32_0 = arith.constant 0 : i32
    %c0_i32_1 = arith.constant 0 : i32
    return %c0_i32, %c0_i32_0 : i32, i32
  }
  func.func @transform_14(%arg0: i32) -> (i32, i32) {
    %c0_i32 = arith.constant 0 : i32
    %c0_i32_0 = arith.constant 0 : i32
    %c0_i32_1 = arith.constant 0 : i32
    return %c0_i32, %c0_i32_0 : i32, i32
  }
  func.func @transform_15(%arg0: i32) -> (i32, i32) {
    %c0_i32 = arith.constant 0 : i32
    %c0_i32_0 = arith.constant 0 : i32
    return %c0_i32, %arg0 : i32, i32
  }
}

</mosaic_0001>

<bundles_post_ra>
// kernel: tpu_custom_call.1
= control target key start
LH: loop header
LB: loop body
LE: loop exit
PB: predicated region body
PF: predicated region fallthrough
CT: control target
= control target key end

     0   :  { %v2789_v3 = vmov 0   ;;  %vm164_vm0 = vcmask 64512   ;;  %s3495_s0 = inlined_call_operand.vmem [shape: f32[8,128], index: 0, kind: input, shape index: {}]   ;;  %s3496_s1 = inlined_call_operand.vmem [shape: f32[128,8], index: 1, kind: input, shape index: {}]   ;;  %s3497_s2 = inlined_call_operand.vmem [shape: f32[128,1], index: 2, kind: input, shape index: {}]   ;;  %s3498_s3 = inlined_call_operand.vmem [shape: f32[128,128], index: 3, kind: input, shape index: {}]   ;;  %s3499_s4 = inlined_call_operand.vmem [shape: f32[128,1], index: 4, kind: input, shape index: {}]   ;;  %s3500_s5 = inlined_call_operand.vmem [shape: f32[128,128], index: 5, kind: input, shape index: {}]   ;;  %s3501_s6 = inlined_call_operand.vmem [shape: f32[128,1], index: 6, kind: input, shape index: {}]   ;;  %s3502_s7 = inlined_call_operand.vmem [shape: f32[128,128], index: 7, kind: input, shape index: {}]   ;;  %s3503_s8 = inlined_call_operand.vmem [shape: f32[128,1], index: 8, kind: input, shape index: {}]   ;;  %s3504_s9 = inlined_call_operand.vmem [shape: f32[128,128], index: 9, kind: input, shape index: {}]   ;;  %s3505_s10 = inlined_call_operand.vmem [shape: f32[128,1], index: 10, kind: input, shape index: {}]   ;;  %s3506_s11 = inlined_call_operand.vmem [shape: f32[128,128], index: 11, kind: input, shape index: {}]   ;;  %s3507_s12 = inlined_call_operand.vmem [shape: f32[128,1], index: 12, kind: input, shape index: {}]   ;;  %s3508_s13 = inlined_call_operand.vmem [shape: f32[8,128], index: 13, kind: input, shape index: {}]   ;;  %s3509_s14 = inlined_call_operand.vmem [shape: f32[8,1], index: 14, kind: input, shape index: {}]   ;;  %s3510_s15 = inlined_call_operand.hbm [shape: f32[8,128], index: 15, kind: output, shape index: {}]  }
   0x1   :  { %v51_v0 = vld [vmem:[%s3495_s0] sm:$0xff]  ;;  %v70_v1 = vld [vmem:[%s3497_s2 + $0x10] sm:$0xff]  ;;  %2572 = vset.pattern.permute.xlu1 %v2789_v3  ;;  %2571 = vset.pattern.permute.xlu0 %v2789_v3  ;;  %v53_v5 = vld [vmem:[%s3496_s1 + $0x8] sm:$0xff] }
   0x2   :  { %v68_v2 = vld [vmem:[%s3497_s2] sm:$0xff]  ;;  %2041 = vmatprep.subr.mxu0 %v51_v0  ;;  %96 = vperm.xlu1 %2572, %v70_v1   ;;  %v71_v6 = vld [vmem:[%s3497_s2 + $0x18] sm:$0xff]  ;;  %v54_v7 = vld [vmem:[%s3496_s1 + $0x10] sm:$0xff] }
   0x3   :  { %v52_v4 = vld [vmem:[%s3496_s1] sm:$0xff]  ;;  %86 = vperm.xlu0 %2571, %v68_v2   ;;  %2042 = vmatpush3.msra.mxu0 %v51_v0  ;;  %v69_v8 = vld [vmem:[%s3497_s2 + $0x8] sm:$0xff]  ;;  %v55_v9 = vld [vmem:[%s3496_s1 + $0x18] sm:$0xff] }
   0x4   :  { %2043 = vmatprep.mubr.msk.f32.mxu0 %vm164_vm0, %v52_v4  ;;  %v73_v10 = vld [vmem:[%s3497_s2 + $0x28] sm:$0xff]  ;;  %v56_v11 = vld [vmem:[%s3496_s1 + $0x20] sm:$0xff]  ;;  %v75_v14 = vld [vmem:[%s3497_s2 + $0x38] sm:$0xff] }
   0x5   :  { %2044 = vmatmul.mubr.msk.f32.vlgmr.msra.gmra.mrb[0].mxu0 %vm164_vm0, %v53_v5  ;;  %v72_v12 = vld [vmem:[%s3497_s2 + $0x20] sm:$0xff]  ;;  %v57_v13 = vld [vmem:[%s3496_s1 + $0x28] sm:$0xff]  ;;  %v58_v15 = vld [vmem:[%s3496_s1 + $0x30] sm:$0xff] }
   0x6   :  { %101 = vperm.xlu1 %2572, %v71_v6   ;;  %2046 = vmatprep.mubr.msk.f32.mxu0 %vm164_vm0, %v54_v7  ;;  %v74_v16 = vld [vmem:[%s3497_s2 + $0x30] sm:$0xff]  ;;  %v59_v17 = vld [vmem:[%s3496_s1 + $0x38] sm:$0xff]  ;;  %v77_v18 = vld [vmem:[%s3497_s2 + $0x48] sm:$0xff] }
   0x7   :  { %91 = vperm.xlu0 %2571, %v69_v8   ;;  %v60_v19 = vld [vmem:[%s3496_s1 + $0x40] sm:$0xff]  ;;  %v61_v21 = vld [vmem:[%s3496_s1 + $0x48] sm:$0xff]  ;;  %v79_v22 = vld [vmem:[%s3497_s2 + $0x58] sm:$0xff] }
   0x8   :  { %v76_v20 = vld [vmem:[%s3497_s2 + $0x40] sm:$0xff]  ;;  %v62_v23 = vld [vmem:[%s3496_s1 + $0x50] sm:$0xff]  ;;  %v63_v25 = vld [vmem:[%s3496_s1 + $0x58] sm:$0xff] }
   0x9   :  { %2047 = vmatmul.mubr.msk.f32.gmra.mrb[2].mxu0 %vm164_vm0, %v55_v9  ;;  %v78_v24 = vld [vmem:[%s3497_s2 + $0x50] sm:$0xff]  ;;  %v81_v26 = vld [vmem:[%s3497_s2 + $0x68] sm:$0xff]  ;;  %v64_v27 = vld [vmem:[%s3496_s1 + $0x60] sm:$0xff] }
   0xa   :  { %111 = vperm.xlu1 %2572, %v73_v10   ;;  %2049 = vmatprep.mubr.msk.f32.mxu0 %vm164_vm0, %v56_v11  ;;  %v80_v28 = vld [vmem:[%s3497_s2 + $0x60] sm:$0xff]  ;;  %v65_v29 = vld [vmem:[%s3496_s1 + $0x68] sm:$0xff]  ;;  %v83_v30 = vld [vmem:[%s3497_s2 + $0x78] sm:$0xff] }
   0xb   :  { %106 = vperm.xlu0 %2571, %v72_v12   ;;  %v66_v31 = vld [vmem:[%s3496_s1 + $0x70] sm:$0xff]  ;;  %v67_v33 = vld [vmem:[%s3496_s1 + $0x78] sm:$0xff]  ;;  %v391_v34 = vld [vmem:[%s3499_s4 + $0x8] sm:$0xff] }
   0xc   :  { %v82_v32 = vld [vmem:[%s3497_s2 + $0x70] sm:$0xff]  ;;  %v390_v35 = vld [vmem:[%s3499_s4] sm:$0xff] }
   0xd   :  { %2050 = vmatmul.mubr.msk.f32.gmra.mrb[4].mxu0 %vm164_vm0, %v57_v13 }
   0xe   :  { %121 = vperm.xlu1 %2572, %v75_v14   ;;  %2052 = vmatprep.mubr.msk.f32.mxu0 %vm164_vm0, %v58_v15 }
   0xf   :  { %116 = vperm.xlu0 %2571, %v74_v16  }
  0x11   :  { %2053 = vmatmul.mubr.msk.f32.gmra.mrb[6].mxu0 %vm164_vm0, %v59_v17 }
  0x12   :  { %131 = vperm.xlu1 %2572, %v77_v18   ;;  %2055 = vmatprep.mubr.msk.f32.mxu0 %vm164_vm0, %v60_v19 }
  0x13   :  { %126 = vperm.xlu0 %2571, %v76_v20  }
  0x15   :  { %2056 = vmatmul.mubr.msk.f32.gmra.mrb[8].mxu0 %vm164_vm0, %v61_v21 }
  0x16   :  { %141 = vperm.xlu1 %2572, %v79_v22   ;;  %2058 = vmatprep.mubr.msk.f32.mxu0 %vm164_vm0, %v62_v23 }
  0x17   :  { %136 = vperm.xlu0 %2571, %v78_v24  }
  0x19   :  { %2059 = vmatmul.mubr.msk.f32.gmra.mrb[10].mxu0 %vm164_vm0, %v63_v25 }
  0x1a   :  { %151 = vperm.xlu1 %2572, %v81_v26   ;;  %2061 = vmatprep.mubr.msk.f32.mxu0 %vm164_vm0, %v64_v27 }
  0x1b   :  { %146 = vperm.xlu0 %2571, %v80_v28  }
  0x1d   :  { %2062 = vmatmul.mubr.msk.f32.gmra.mrb[12].mxu0 %vm164_vm0, %v65_v29 }
  0x1e   :  { %161 = vperm.xlu1 %2572, %v83_v30   ;;  %2064 = vmatprep.mubr.msk.f32.mxu0 %vm164_vm0, %v66_v31 }
  0x1f   :  { %156 = vperm.xlu0 %2571, %v82_v32  }
  0x20   :  { %20 = vsyncpa [#allocation3], 0  ;;  %v393_v36 = vld [vmem:[%s3499_s4 + $0x18] sm:$0xff]  ;;  %v392_v37 = vld [vmem:[%s3499_s4 + $0x10] sm:$0xff]  ;;  %vm2791_vm1 = vmmov 0  }
  0x21   :  { %2065 = vmatmul.mubr.msk.f32.gmra.mrb[14].mxu0 %vm164_vm0, %v67_v33  ;;  %v395_v38 = vld [vmem:[%s3499_s4 + $0x28] sm:$0xff]  ;;  %v394_v39 = vld [vmem:[%s3499_s4 + $0x20] sm:$0xff]  ;;  %v397_v40 = vld [vmem:[%s3499_s4 + $0x38] sm:$0xff] }
  0x22   :  { %413 = vperm.xlu1 %2572, %v391_v34   ;;  %v396_v41 = vld [vmem:[%s3499_s4 + $0x30] sm:$0xff]  ;;  %v399_v42 = vld [vmem:[%s3499_s4 + $0x48] sm:$0xff]  ;;  %v398_v43 = vld [vmem:[%s3499_s4 + $0x40] sm:$0xff] }
  0x23   :  { %408 = vperm.xlu0 %2571, %v390_v35   ;;  %v401_v44 = vld [vmem:[%s3499_s4 + $0x58] sm:$0xff]  ;;  %v400_v45 = vld [vmem:[%s3499_s4 + $0x50] sm:$0xff]  ;;  %v403_v46 = vld [vmem:[%s3499_s4 + $0x68] sm:$0xff] }
  0x24   :  { %v402_v47 = vld [vmem:[%s3499_s4 + $0x60] sm:$0xff]  ;;  %v405_v48 = vld [vmem:[%s3499_s4 + $0x78] sm:$0xff]  ;;  %v404_v49 = vld [vmem:[%s3499_s4 + $0x70] sm:$0xff] }
  0x25   :  { %v664_v50 = vld [vmem:[%s3501_s6 + $0x8] sm:$0xff]  ;;  %v663_v51 = vld [vmem:[%s3501_s6] sm:$0xff]  ;;  %v666_v52 = vld [vmem:[%s3501_s6 + $0x18] sm:$0xff] }
  0x26   :  { %423 = vperm.xlu1 %2572, %v393_v36   ;;  %v665_v53 = vld [vmem:[%s3501_s6 + $0x10] sm:$0xff]  ;;  %v668_v54 = vld [vmem:[%s3501_s6 + $0x28] sm:$0xff]  ;;  %v667_v55 = vld [vmem:[%s3501_s6 + $0x20] sm:$0xff] }
  0x27   :  { %418 = vperm.xlu0 %2571, %v392_v37   ;;  %v670_v56 = vld [vmem:[%s3501_s6 + $0x38] sm:$0xff]  ;;  %v669_v57 = vld [vmem:[%s3501_s6 + $0x30] sm:$0xff]  ;;  %v672_v58 = vld [vmem:[%s3501_s6 + $0x48] sm:$0xff] }
  0x28   :  { %v671_v59 = vld [vmem:[%s3501_s6 + $0x40] sm:$0xff]  ;;  %v674_v60 = vld [vmem:[%s3501_s6 + $0x58] sm:$0xff]  ;;  %v673_v61 = vld [vmem:[%s3501_s6 + $0x50] sm:$0xff] }
  0x29   :  { %v676_v62 = vld [vmem:[%s3501_s6 + $0x68] sm:$0xff]  ;;  %v675_v63 = vld [vmem:[%s3501_s6 + $0x60] sm:$0xff]  ;;  %v678_v0 = vld [vmem:[%s3501_s6 + $0x78] sm:$0xff] }
  0x2a   :  { %433 = vperm.xlu1 %2572, %v395_v38   ;;  %v677_v1 = vld [vmem:[%s3501_s6 + $0x70] sm:$0xff]  ;;  %v937_v2 = vld [vmem:[%s3503_s8 + $0x8] sm:$0xff]  ;;  %v936_v3 = vld [vmem:[%s3503_s8] sm:$0xff] }
  0x2b   :  { %428 = vperm.xlu0 %2571, %v394_v39   ;;  %v939_v4 = vld [vmem:[%s3503_s8 + $0x18] sm:$0xff]  ;;  %v938_v5 = vld [vmem:[%s3503_s8 + $0x10] sm:$0xff]  ;;  %v941_v6 = vld [vmem:[%s3503_s8 + $0x28] sm:$0xff] }
  0x2c   :  { %v940_v7 = vld [vmem:[%s3503_s8 + $0x20] sm:$0xff]  ;;  %v943_v8 = vld [vmem:[%s3503_s8 + $0x38] sm:$0xff]  ;;  %v942_v9 = vld [vmem:[%s3503_s8 + $0x30] sm:$0xff] }
  0x2d   :  { %v945_v10 = vld [vmem:[%s3503_s8 + $0x48] sm:$0xff]  ;;  %v944_v11 = vld [vmem:[%s3503_s8 + $0x40] sm:$0xff]  ;;  %v947_v12 = vld [vmem:[%s3503_s8 + $0x58] sm:$0xff] }
  0x2e   :  { %443 = vperm.xlu1 %2572, %v397_v40   ;;  %v946_v13 = vld [vmem:[%s3503_s8 + $0x50] sm:$0xff]  ;;  %v949_v14 = vld [vmem:[%s3503_s8 + $0x68] sm:$0xff]  ;;  %v948_v15 = vld [vmem:[%s3503_s8 + $0x60] sm:$0xff] }
  0x2f   :  { %438 = vperm.xlu0 %2571, %v396_v41   ;;  %v951_v16 = vld [vmem:[%s3503_s8 + $0x78] sm:$0xff]  ;;  %v950_v17 = vld [vmem:[%s3503_s8 + $0x70] sm:$0xff]  ;;  %v1210_v18 = vld [vmem:[%s3505_s10 + $0x8] sm:$0xff] }
  0x30   :  { %v1209_v19 = vld [vmem:[%s3505_s10] sm:$0xff]  ;;  %v1212_v20 = vld [vmem:[%s3505_s10 + $0x18] sm:$0xff]  ;;  %v1211_v21 = vld [vmem:[%s3505_s10 + $0x10] sm:$0xff] }
  0x31   :  { %v374_v22 = vld [vmem:[%s3498_s3] sm:$0xff]  ;;  %v1214_v23 = vld [vmem:[%s3505_s10 + $0x28] sm:$0xff]  ;;  %v1216_v25 = vld [vmem:[%s3505_s10 + $0x38] sm:$0xff] }
  0x32   :  { %453 = vperm.xlu1 %2572, %v399_v42   ;;  %2099 = vmatprep.mubr.f32.mxu1 %v374_v22  ;;  %v1213_v24 = vld [vmem:[%s3505_s10 + $0x20] sm:$0xff]  ;;  %v1215_v26 = vld [vmem:[%s3505_s10 + $0x30] sm:$0xff]  ;;  %v1218_v27 = vld [vmem:[%s3505_s10 + $0x48] sm:$0xff] }
  0x33   :  { %448 = vperm.xlu0 %2571, %v398_v43   ;;  %v1217_v28 = vld [vmem:[%s3505_s10 + $0x40] sm:$0xff]  ;;  %v1220_v29 = vld [vmem:[%s3505_s10 + $0x58] sm:$0xff]  ;;  %v1219_v30 = vld [vmem:[%s3505_s10 + $0x50] sm:$0xff] }
  0x34   :  { %v1222_v31 = vld [vmem:[%s3505_s10 + $0x68] sm:$0xff]  ;;  %v1221_v32 = vld [vmem:[%s3505_s10 + $0x60] sm:$0xff]  ;;  %v1224_v33 = vld [vmem:[%s3505_s10 + $0x78] sm:$0xff] }
  0x35   :  { %v1223_v34 = vld [vmem:[%s3505_s10 + $0x70] sm:$0xff]  ;;  %v1483_v35 = vld [vmem:[%s3507_s12 + $0x8] sm:$0xff]  ;;  %v1482_v36 = vld [vmem:[%s3507_s12] sm:$0xff] }
  0x36   :  { %463 = vperm.xlu1 %2572, %v401_v44   ;;  %v1485_v37 = vld [vmem:[%s3507_s12 + $0x18] sm:$0xff]  ;;  %v1484_v38 = vld [vmem:[%s3507_s12 + $0x10] sm:$0xff]  ;;  %v1487_v39 = vld [vmem:[%s3507_s12 + $0x28] sm:$0xff] }
  0x37   :  { %458 = vperm.xlu0 %2571, %v400_v45   ;;  %v1486_v40 = vld [vmem:[%s3507_s12 + $0x20] sm:$0xff]  ;;  %v1489_v41 = vld [vmem:[%s3507_s12 + $0x38] sm:$0xff]  ;;  %v1488_v42 = vld [vmem:[%s3507_s12 + $0x30] sm:$0xff] }
  0x38   :  { %v1491_v43 = vld [vmem:[%s3507_s12 + $0x48] sm:$0xff]  ;;  %v1490_v44 = vld [vmem:[%s3507_s12 + $0x40] sm:$0xff]  ;;  %v1493_v45 = vld [vmem:[%s3507_s12 + $0x58] sm:$0xff] }
  0x3a   :  { %473 = vperm.xlu1 %2572, %v403_v46   ;;  %v1492_v46 = vld [vmem:[%s3507_s12 + $0x50] sm:$0xff] }
  0x3b   :  { %468 = vperm.xlu0 %2571, %v402_v47   ;;  %v1495_v47 = vld [vmem:[%s3507_s12 + $0x68] sm:$0xff] }
  0x3e   :  { %483 = vperm.xlu1 %2572, %v405_v48   ;;  %v1494_v48 = vld [vmem:[%s3507_s12 + $0x60] sm:$0xff] }
  0x3f   :  { %478 = vperm.xlu0 %2571, %v404_v49   ;;  %v1497_v49 = vld [vmem:[%s3507_s12 + $0x78] sm:$0xff] }
  0x42   :  { %686 = vperm.xlu1 %2572, %v664_v50   ;;  %v1496_v50 = vld [vmem:[%s3507_s12 + $0x70] sm:$0xff] }
  0x43   :  { %681 = vperm.xlu0 %2571, %v663_v51   ;;  %v1740_v51 = vld [vmem:[%s3509_s14] sm:$0xff]  ;;  %s2793_s14 = smov [#allocation2]  }
  0x44   :  { %s1823_s4 = sshll.u32 %s2793_s14, 4  ;;  %s1824_s4 = int_to_ptr.vmem [resolvable:$true] %s1823_s4 }
  0x45   :  { %s2765_s2 = scalar_lea.vmem %s1824_s4, 128  ;;  %p2770_p1 = scmp.lt.s32.totalorder %s1824_s4, %s1824_s4 }
  0x46   :  { %696 = vperm.xlu1 %2572, %v666_v52   ;;  %p2766_p0 = scmp.ne.s32.totalorder %s1824_s4, %s2765_s2  ;;  %p2771_p2 = scmp.lt.s32.totalorder %s2765_s2, %s2765_s2 }
  0x47   :  { %691 = vperm.xlu0 %2571, %v665_v53  }
  0x48   :  { %p2772_p3 = por %p2771_p2, %p2770_p1 }
  0x4a   :  { %706 = vperm.xlu1 %2572, %v668_v54   ;;  %p2773_p4 = pnand %p2772_p3, %p2766_p0 }
  0x4b   :  { %701 = vperm.xlu0 %2571, %v667_v55  }
  0x4e   :  { %716 = vperm.xlu1 %2572, %v670_v56  }
  0x4f   :  { %711 = vperm.xlu0 %2571, %v669_v57  }
  0x52   :  { %726 = vperm.xlu1 %2572, %v672_v58  }
  0x53   :  { %721 = vperm.xlu0 %2571, %v671_v59  }
  0x56   :  { %736 = vperm.xlu1 %2572, %v674_v60  }
  0x57   :  { %731 = vperm.xlu0 %2571, %v673_v61  }
  0x5a   :  { %746 = vperm.xlu1 %2572, %v676_v62  }
  0x5b   :  { %741 = vperm.xlu0 %2571, %v675_v63  }
  0x5e   :  { %756 = vperm.xlu1 %2572, %v678_v0  }
  0x5f   :  { %751 = vperm.xlu0 %2571, %v677_v1  }
  0x62   :  { %959 = vperm.xlu1 %2572, %v937_v2  }
  0x63   :  { %954 = vperm.xlu0 %2571, %v936_v3  }
  0x66   :  { %969 = vperm.xlu1 %2572, %v939_v4  }
  0x67   :  { %964 = vperm.xlu0 %2571, %v938_v5  }
  0x6a   :  { %979 = vperm.xlu1 %2572, %v941_v6  }
  0x6b   :  { %974 = vperm.xlu0 %2571, %v940_v7  }
  0x6e   :  { %989 = vperm.xlu1 %2572, %v943_v8  }
  0x6f   :  { %984 = vperm.xlu0 %2571, %v942_v9  }
  0x72   :  { %999 = vperm.xlu1 %2572, %v945_v10  }
  0x73   :  { %994 = vperm.xlu0 %2571, %v944_v11  }
  0x76   :  { %1009 = vperm.xlu1 %2572, %v947_v12  }
  0x77   :  { %1004 = vperm.xlu0 %2571, %v946_v13  }
  0x7a   :  { %1019 = vperm.xlu1 %2572, %v949_v14  }
  0x7b   :  { %1014 = vperm.xlu0 %2571, %v948_v15  }
  0x7e   :  { %1029 = vperm.xlu1 %2572, %v951_v16  }
  0x7f   :  { %1024 = vperm.xlu0 %2571, %v950_v17  }
  0x81   :  { %v97_v52 = vpop.permute.xlu1 %96 }
  0x82   :  { %1232 = vperm.xlu1 %2572, %v1210_v18   ;;  %v87_v53 = vpop.permute.xlu0 %86 }
  0x83   :  { %1227 = vperm.xlu0 %2571, %v1209_v19  }
  0x85   :  { %v102_v54 = vpop.permute.xlu1 %101 }
  0x86   :  { %1242 = vperm.xlu1 %2572, %v1212_v20   ;;  %v92_v55 = vpop.permute.xlu0 %91 }
  0x87   :  { %1237 = vperm.xlu0 %2571, %v1211_v21  }
  0x89   :  { %v112_v56 = vpop.permute.xlu1 %111 }
  0x8a   :  { %1252 = vperm.xlu1 %2572, %v1214_v23   ;;  %v107_v57 = vpop.permute.xlu0 %106 }
  0x8b   :  { %1247 = vperm.xlu0 %2571, %v1213_v24  }
  0x8d   :  { %v122_v62 = vpop.permute.xlu1 %121 }
  0x8e   :  { %1262 = vperm.xlu1 %2572, %v1216_v25   ;;  %v117_v0 = vpop.permute.xlu0 %116 }
  0x8f   :  { %1257 = vperm.xlu0 %2571, %v1215_v26  }
  0x91   :  { %v132_v7 = vpop.permute.xlu1 %131 }
  0x92   :  { %1272 = vperm.xlu1 %2572, %v1218_v27   ;;  %v127_v9 = vpop.permute.xlu0 %126 }
  0x93   :  { %1267 = vperm.xlu0 %2571, %v1217_v28  }
  0x95   :  { %v142_v17 = vpop.permute.xlu1 %141 }
  0x96   :  { %1282 = vperm.xlu1 %2572, %v1220_v29   ;;  %v137_v20 = vpop.permute.xlu0 %136 }
  0x97   :  { %1277 = vperm.xlu0 %2571, %v1219_v30  }
  0x9a   :  { %1292 = vperm.xlu1 %2572, %v1222_v31   ;;  %v152_v31 = vpop.permute.xlu1 %151 }
  0x9b   :  { %1287 = vperm.xlu0 %2571, %v1221_v32  }
  0x9e   :  { %1302 = vperm.xlu1 %2572, %v1224_v33   ;;  %v147_v33 = vpop.permute.xlu0 %146 }
  0x9f   :  { %1297 = vperm.xlu0 %2571, %v1223_v34  }
  0xa2   :  { %1505 = vperm.xlu1 %2572, %v1483_v35  }
  0xa3   :  { %1500 = vperm.xlu0 %2571, %v1482_v36  }
  0xa6   :  { %1515 = vperm.xlu1 %2572, %v1485_v37  }
  0xa7   :  { %1510 = vperm.xlu0 %2571, %v1484_v38  }
  0xaa   :  { %1525 = vperm.xlu1 %2572, %v1487_v39  }
  0xab   :  { %1520 = vperm.xlu0 %2571, %v1486_v40  }
  0xae   :  { %1535 = vperm.xlu1 %2572, %v1489_v41  }
  0xaf   :  { %1530 = vperm.xlu0 %2571, %v1488_v42   ;;  %v162_v42 = vpop.permute.xlu1 %161 }
  0xb2   :  { %1545 = vperm.xlu1 %2572, %v1491_v43  }
  0xb3   :  { %1540 = vperm.xlu0 %2571, %v1490_v44  }
  0xb6   :  { %1555 = vperm.xlu1 %2572, %v1493_v45   ;;  %v157_v45 = vpop.permute.xlu0 %156 }
  0xb7   :  { %1550 = vperm.xlu0 %2571, %v1492_v46  }
  0xba   :  { %1565 = vperm.xlu1 %2572, %v1495_v47  }
  0xbb   :  { %1560 = vperm.xlu0 %2571, %v1494_v48  }
  0xbe   :  { %1575 = vperm.xlu1 %2572, %v1497_v49  }
  0xbf   :  { %1570 = vperm.xlu0 %2571, %v1496_v50  }
  0xc3   :  { %1743 = vperm.xlu0 %2571, %v1740_v51  }
  0xd8   :  { %v2045_v58 = vpop.f32.mrb[0].mxu0 }
  0xd9   :  { %v285_v59 = vadd.f32 %v2045_v58, %v92_v55  ;;  %v279_v60 = vpop.f32.mrb[1].mxu0 }
  0xda   :  { %v280_v61 = vadd.f32 %v279_v60, %v87_v53  ;;  %v375_v60 = vld [vmem:[%s3498_s3 + $0x8] sm:$0xff] }
  0xdb   :  { %2573 = vtanh.f32 %v285_v59 }
  0xdc   :  { %2575 = vtanh.f32 %v280_v61  ;;  %v2048_v63 = vpop.f32.mrb[2].mxu0  ;;  %v376_v61 = vld [vmem:[%s3498_s3 + $0x10] sm:$0xff] }
  0xdd   :  { %v295_v1 = vadd.f32 %v2048_v63, %v102_v54  ;;  %v289_v2 = vpop.f32.mrb[3].mxu0  ;;  %v378_v63 = vld [vmem:[%s3498_s3 + $0x20] sm:$0xff] }
  0xde   :  { %v290_v3 = vadd.f32 %v289_v2, %v97_v52  ;;  %v381_v2 = vld [vmem:[%s3498_s3 + $0x38] sm:$0xff] }
  0xdf   :  { %2577 = vtanh.f32 %v295_v1  ;;  %v380_v1 = vld [vmem:[%s3498_s3 + $0x30] sm:$0xff] }
  0xe0   :  { %2579 = vtanh.f32 %v290_v3  ;;  %v2051_v4 = vpop.f32.mrb[4].mxu0  ;;  %v382_v3 = vld [vmem:[%s3498_s3 + $0x40] sm:$0xff] }
  0xe1   :  { %v305_v5 = vadd.f32 %v2051_v4, %v112_v56  ;;  %v299_v6 = vpop.f32.mrb[5].mxu0  ;;  %v383_v4 = vld [vmem:[%s3498_s3 + $0x48] sm:$0xff] }
  0xe2   :  { %v300_v8 = vadd.f32 %v299_v6, %v107_v57  ;;  %v385_v6 = vld [vmem:[%s3498_s3 + $0x58] sm:$0xff] }
  0xe3   :  { %2581 = vtanh.f32 %v305_v5  ;;  %v384_v5 = vld [vmem:[%s3498_s3 + $0x50] sm:$0xff] }
  0xe4   :  { %2583 = vtanh.f32 %v300_v8  ;;  %v2054_v10 = vpop.f32.mrb[6].mxu0  ;;  %v387_v8 = vld [vmem:[%s3498_s3 + $0x68] sm:$0xff] }
  0xe5   :  { %v2574_v11 = vpop.eup %2573  ;;  %v315_v12 = vadd.f32 %v2054_v10, %v122_v62  ;;  %v309_v13 = vpop.f32.mrb[7].mxu0  ;;  %v377_v62 = vld [vmem:[%s3498_s3 + $0x18] sm:$0xff] }
  0xe6   :  { %v2576_v14 = vpop.eup %2575  ;;  %v310_v15 = vadd.f32 %v309_v13, %v117_v0  ;;  %v379_v0 = vld [vmem:[%s3498_s3 + $0x28] sm:$0xff]  ;;  %v389_v10 = vld [vmem:[%s3498_s3 + $0x78] sm:$0xff]  ;;  %v409_v13 = vpop.permute.xlu0 %408 }
  0xe7   :  { %2585 = vtanh.f32 %v315_v12  ;;  %v2382_v16 = vpack.c.bf16 %v2574_v11, %v2576_v14  ;;  %v647_v11 = vld [vmem:[%s3500_s5] sm:$0xff]  ;;  %v414_v12 = vpop.permute.xlu1 %413 }
  0xe8   :  { %2587 = vtanh.f32 %v310_v15  ;;  %v2057_v18 = vpop.f32.mrb[8].mxu0  ;;  %2155 = vmatprep.mubr.f32.mxu0 %v647_v11 }
  0xe9   :  { %v2578_v19 = vpop.eup %2577  ;;  %v325_v21 = vadd.f32 %v2057_v18, %v132_v7  ;;  %v319_v22 = vpop.f32.mrb[9].mxu0  ;;  %2383 = vmatprep.subr.bf16.mxu1 %v2382_v16  ;;  %v386_v7 = vld [vmem:[%s3498_s3 + $0x60] sm:$0xff] }
  0xea   :  { %v2580_v23 = vpop.eup %2579  ;;  %v320_v24 = vadd.f32 %v319_v22, %v127_v9  ;;  %2385 = vmatpush3.bf16.msra.mxu1 %v2382_v16  ;;  %v388_v9 = vld [vmem:[%s3498_s3 + $0x70] sm:$0xff]  ;;  %v419_v15 = vpop.permute.xlu0 %418 }
  0xeb   :  { %2589 = vtanh.f32 %v325_v21  ;;  %v2386_v25 = vpack.c.bf16 %v2578_v19, %v2580_v23  ;;  %v424_v14 = vpop.permute.xlu1 %423 }
  0xec   :  { %2591 = vtanh.f32 %v320_v24  ;;  %v2060_v26 = vpop.f32.mrb[10].mxu0 }
  0xed   :  { %v2582_v27 = vpop.eup %2581  ;;  %v335_v28 = vadd.f32 %v2060_v26, %v142_v17  ;;  %v329_v29 = vpop.f32.mrb[11].mxu0  ;;  %2387 = vmatprep.subr.bf16.mxu1 %v2386_v25 }
  0xee   :  { %v2584_v30 = vpop.eup %2583  ;;  %v330_v32 = vadd.f32 %v329_v29, %v137_v20  ;;  %2389 = vmatpush3.bf16.msra.mxu1 %v2386_v25  ;;  %v429_v17 = vpop.permute.xlu0 %428 }
  0xef   :  { %2593 = vtanh.f32 %v335_v28  ;;  %v2390_v34 = vpack.c.bf16 %v2582_v27, %v2584_v30  ;;  %v434_v16 = vpop.permute.xlu1 %433 }
  0xf0   :  { %2595 = vtanh.f32 %v330_v32  ;;  %v2063_v35 = vpop.f32.mrb[12].mxu0 }
  0xf1   :  { %v2586_v36 = vpop.eup %2585  ;;  %v345_v37 = vadd.f32 %v2063_v35, %v152_v31  ;;  %v339_v38 = vpop.f32.mrb[13].mxu0  ;;  %2391 = vmatprep.subr.bf16.mxu1 %v2390_v34 }
  0xf2   :  { %v2588_v39 = vpop.eup %2587  ;;  %v340_v40 = vadd.f32 %v339_v38, %v147_v33  ;;  %2393 = vmatpush3.bf16.msra.mxu1 %v2390_v34  ;;  %v439_v24 = vpop.permute.xlu0 %438 }
  0xf3   :  { %2597 = vtanh.f32 %v345_v37  ;;  %v2394_v41 = vpack.c.bf16 %v2586_v36, %v2588_v39  ;;  %v444_v22 = vpop.permute.xlu1 %443 }
  0xf4   :  { %2599 = vtanh.f32 %v340_v40  ;;  %v2066_v43 = vpop.f32.mrb[14].mxu0 }
  0xf5   :  { %v2590_v44 = vpop.eup %2589  ;;  %v355_v46 = vadd.f32 %v2066_v43, %v162_v42  ;;  %v349_v47 = vpop.f32.mrb[15].mxu0  ;;  %2395 = vmatprep.subr.bf16.mxu1 %v2394_v41 }
  0xf6   :  { %v2592_v48 = vpop.eup %2591  ;;  %v350_v49 = vadd.f32 %v349_v47, %v157_v45  ;;  %2397 = vmatpush3.bf16.msra.mxu1 %v2394_v41  ;;  %v449_v33 = vpop.permute.xlu0 %448 }
  0xf7   :  { %2601 = vtanh.f32 %v355_v46  ;;  %v2398_v50 = vpack.c.bf16 %v2590_v44, %v2592_v48  ;;  %v454_v31 = vpop.permute.xlu1 %453 }
  0xf8   :  { %2603 = vtanh.f32 %v350_v49 }
  0xf9   :  { %v2594_v51 = vpop.eup %2593  ;;  %2399 = vmatprep.subr.bf16.mxu1 %v2398_v50 }
  0xfa   :  { %v2596_v52 = vpop.eup %2595  ;;  %2401 = vmatpush3.bf16.msra.mxu1 %v2398_v50  ;;  %v459_v44 = vpop.permute.xlu0 %458 }
  0xfb   :  { %v2402_v53 = vpack.c.bf16 %v2594_v51, %v2596_v52  ;;  %v464_v41 = vpop.permute.xlu1 %463 }
  0xfd   :  { %v2598_v54 = vpop.eup %2597  ;;  %2403 = vmatprep.subr.bf16.mxu1 %v2402_v53 }
  0xfe   :  { %v2600_v55 = vpop.eup %2599  ;;  %2405 = vmatpush3.bf16.msra.mxu1 %v2402_v53 }
  0xff   :  { %v2406_v56 = vpack.c.bf16 %v2598_v54, %v2600_v55  ;;  %v474_v55 = vpop.permute.xlu1 %473 }
 0x101   :  { %v2602_v57 = vpop.eup %2601  ;;  %2407 = vmatprep.subr.bf16.mxu1 %v2406_v56 }
 0x102   :  { %v2604_v58 = vpop.eup %2603  ;;  %2409 = vmatpush3.bf16.msra.mxu1 %v2406_v56 }
 0x103   :  { %v2410_v59 = vpack.c.bf16 %v2602_v57, %v2604_v58  ;;  %v469_v57 = vpop.permute.xlu0 %468 }
 0x105   :  { %2411 = vmatprep.subr.bf16.mxu1 %v2410_v59 }
 0x106   :  { %2413 = vmatpush3.bf16.msra.mxu1 %v2410_v59 }
 0x109   :  { %2100 = vmatmul.mubr.f32.vlgmr.msra.gmra.mrb[0].mxu1 %v375_v60 }
 0x10a   :  { %2102 = vmatprep.mubr.f32.mxu1 %v376_v61 }
 0x10d   :  { %2103 = vmatmul.mubr.f32.gmra.mrb[2].mxu1 %v377_v62 }
 0x10e   :  { %2105 = vmatprep.mubr.f32.mxu1 %v378_v63 }
 0x111   :  { %2106 = vmatmul.mubr.f32.gmra.mrb[4].mxu1 %v379_v0 }
 0x112   :  { %2108 = vmatprep.mubr.f32.mxu1 %v380_v1 }
 0x115   :  { %2109 = vmatmul.mubr.f32.gmra.mrb[6].mxu1 %v381_v2  ;;  %v484_v2 = vpop.permute.xlu1 %483 }
 0x116   :  { %2111 = vmatprep.mubr.f32.mxu1 %v382_v3 }
 0x119   :  { %2112 = vmatmul.mubr.f32.gmra.mrb[8].mxu1 %v383_v4 }
 0x11a   :  { %2114 = vmatprep.mubr.f32.mxu1 %v384_v5  ;;  %v479_v5 = vpop.permute.xlu0 %478 }
 0x11d   :  { %2115 = vmatmul.mubr.f32.gmra.mrb[10].mxu1 %v385_v6 }
 0x11e   :  { %2117 = vmatprep.mubr.f32.mxu1 %v386_v7 }
 0x121   :  { %2118 = vmatmul.mubr.f32.gmra.mrb[12].mxu1 %v387_v8 }
 0x122   :  { %2120 = vmatprep.mubr.f32.mxu1 %v388_v9 }
 0x125   :  { %2121 = vmatmul.mubr.f32.gmra.mrb[14].mxu1 %v389_v10 }
 0x1dc   :  { %v2101_v18 = vpop.f32.mrb[0].mxu1 }
 0x1dd   :  { %v558_v19 = vadd.f32 %v2101_v18, %v414_v12  ;;  %v552_v20 = vpop.f32.mrb[1].mxu1 }
 0x1de   :  { %v553_v21 = vadd.f32 %v552_v20, %v409_v13  ;;  %v648_v20 = vld [vmem:[%s3500_s5 + $0x8] sm:$0xff] }
 0x1df   :  { %2605 = vtanh.f32 %v558_v19 }
 0x1e0   :  { %2607 = vtanh.f32 %v553_v21  ;;  %v2104_v23 = vpop.f32.mrb[2].mxu1  ;;  %v649_v21 = vld [vmem:[%s3500_s5 + $0x10] sm:$0xff] }
 0x1e1   :  { %v568_v25 = vadd.f32 %v2104_v23, %v424_v14  ;;  %v562_v26 = vpop.f32.mrb[3].mxu1  ;;  %v651_v23 = vld [vmem:[%s3500_s5 + $0x20] sm:$0xff] }
 0x1e2   :  { %v563_v27 = vadd.f32 %v562_v26, %v419_v15  ;;  %v654_v26 = vld [vmem:[%s3500_s5 + $0x38] sm:$0xff] }
 0x1e3   :  { %2609 = vtanh.f32 %v568_v25  ;;  %v653_v25 = vld [vmem:[%s3500_s5 + $0x30] sm:$0xff] }
 0x1e4   :  { %2611 = vtanh.f32 %v563_v27  ;;  %v2107_v28 = vpop.f32.mrb[4].mxu1  ;;  %v655_v27 = vld [vmem:[%s3500_s5 + $0x40] sm:$0xff] }
 0x1e5   :  { %v578_v29 = vadd.f32 %v2107_v28, %v434_v16  ;;  %v572_v30 = vpop.f32.mrb[5].mxu1  ;;  %v656_v28 = vld [vmem:[%s3500_s5 + $0x48] sm:$0xff] }
 0x1e6   :  { %v573_v32 = vadd.f32 %v572_v30, %v429_v17  ;;  %v658_v30 = vld [vmem:[%s3500_s5 + $0x58] sm:$0xff] }
 0x1e7   :  { %2613 = vtanh.f32 %v578_v29  ;;  %v657_v29 = vld [vmem:[%s3500_s5 + $0x50] sm:$0xff] }
 0x1e8   :  { %2615 = vtanh.f32 %v573_v32  ;;  %v2110_v34 = vpop.f32.mrb[6].mxu1  ;;  %v660_v32 = vld [vmem:[%s3500_s5 + $0x68] sm:$0xff] }
 0x1e9   :  { %v2606_v35 = vpop.eup %2605  ;;  %v588_v36 = vadd.f32 %v2110_v34, %v444_v22  ;;  %v582_v37 = vpop.f32.mrb[7].mxu1  ;;  %v650_v22 = vld [vmem:[%s3500_s5 + $0x18] sm:$0xff] }
 0x1ea   :  { %v2608_v38 = vpop.eup %2607  ;;  %v583_v39 = vadd.f32 %v582_v37, %v439_v24  ;;  %v652_v24 = vld [vmem:[%s3500_s5 + $0x28] sm:$0xff]  ;;  %v662_v34 = vld [vmem:[%s3500_s5 + $0x78] sm:$0xff]  ;;  %v682_v37 = vpop.permute.xlu0 %681 }
 0x1eb   :  { %2617 = vtanh.f32 %v588_v36  ;;  %v2414_v40 = vpack.c.bf16 %v2606_v35, %v2608_v38  ;;  %v920_v35 = vld [vmem:[%s3502_s7] sm:$0xff]  ;;  %v687_v36 = vpop.permute.xlu1 %686 }
 0x1ec   :  { %2619 = vtanh.f32 %v583_v39  ;;  %v2113_v42 = vpop.f32.mrb[8].mxu1  ;;  %2211 = vmatprep.mubr.f32.mxu1 %v920_v35 }
 0x1ed   :  { %v2610_v43 = vpop.eup %2609  ;;  %v598_v45 = vadd.f32 %v2113_v42, %v454_v31  ;;  %v592_v46 = vpop.f32.mrb[9].mxu1  ;;  %2415 = vmatprep.subr.bf16.mxu0 %v2414_v40  ;;  %v659_v31 = vld [vmem:[%s3500_s5 + $0x60] sm:$0xff] }
 0x1ee   :  { %v2612_v47 = vpop.eup %2611  ;;  %v593_v48 = vadd.f32 %v592_v46, %v449_v33  ;;  %2417 = vmatpush3.bf16.msra.mxu0 %v2414_v40  ;;  %v661_v33 = vld [vmem:[%s3500_s5 + $0x70] sm:$0xff]  ;;  %v692_v39 = vpop.permute.xlu0 %691 }
 0x1ef   :  { %2621 = vtanh.f32 %v598_v45  ;;  %v2418_v49 = vpack.c.bf16 %v2610_v43, %v2612_v47  ;;  %v697_v38 = vpop.permute.xlu1 %696 }
 0x1f0   :  { %2623 = vtanh.f32 %v593_v48  ;;  %v2116_v50 = vpop.f32.mrb[10].mxu1 }
 0x1f1   :  { %v2614_v51 = vpop.eup %2613  ;;  %v608_v52 = vadd.f32 %v2116_v50, %v464_v41  ;;  %v602_v53 = vpop.f32.mrb[11].mxu1  ;;  %2419 = vmatprep.subr.bf16.mxu0 %v2418_v49 }
 0x1f2   :  { %v2616_v54 = vpop.eup %2615  ;;  %v603_v56 = vadd.f32 %v602_v53, %v459_v44  ;;  %2421 = vmatpush3.bf16.msra.mxu0 %v2418_v49  ;;  %v702_v41 = vpop.permute.xlu0 %701 }
 0x1f3   :  { %2625 = vtanh.f32 %v608_v52  ;;  %v2422_v58 = vpack.c.bf16 %v2614_v51, %v2616_v54  ;;  %v707_v40 = vpop.permute.xlu1 %706 }
 0x1f4   :  { %2627 = vtanh.f32 %v603_v56  ;;  %v2119_v59 = vpop.f32.mrb[12].mxu1 }
 0x1f5   :  { %v2618_v60 = vpop.eup %2617  ;;  %v618_v61 = vadd.f32 %v2119_v59, %v474_v55  ;;  %v612_v62 = vpop.f32.mrb[13].mxu1  ;;  %2423 = vmatprep.subr.bf16.mxu0 %v2422_v58 }
 0x1f6   :  { %v2620_v63 = vpop.eup %2619  ;;  %v613_v0 = vadd.f32 %v612_v62, %v469_v57  ;;  %2425 = vmatpush3.bf16.msra.mxu0 %v2422_v58  ;;  %v712_v48 = vpop.permute.xlu0 %711 }
 0x1f7   :  { %2629 = vtanh.f32 %v618_v61  ;;  %v2426_v1 = vpack.c.bf16 %v2618_v60, %v2620_v63  ;;  %v717_v46 = vpop.permute.xlu1 %716 }
 0x1f8   :  { %2631 = vtanh.f32 %v613_v0  ;;  %v2122_v3 = vpop.f32.mrb[14].mxu1 }
 0x1f9   :  { %v2622_v4 = vpop.eup %2621  ;;  %v628_v6 = vadd.f32 %v2122_v3, %v484_v2  ;;  %v622_v7 = vpop.f32.mrb[15].mxu1  ;;  %2427 = vmatprep.subr.bf16.mxu0 %v2426_v1 }
 0x1fa   :  { %v2624_v8 = vpop.eup %2623  ;;  %v623_v9 = vadd.f32 %v622_v7, %v479_v5  ;;  %2429 = vmatpush3.bf16.msra.mxu0 %v2426_v1  ;;  %v722_v57 = vpop.permute.xlu0 %721 }
 0x1fb   :  { %2633 = vtanh.f32 %v628_v6  ;;  %v2430_v10 = vpack.c.bf16 %v2622_v4, %v2624_v8  ;;  %v727_v55 = vpop.permute.xlu1 %726 }
 0x1fc   :  { %2635 = vtanh.f32 %v623_v9 }
 0x1fd   :  { %v2626_v11 = vpop.eup %2625  ;;  %2431 = vmatprep.subr.bf16.mxu0 %v2430_v10 }
 0x1fe   :  { %v2628_v12 = vpop.eup %2627  ;;  %2433 = vmatpush3.bf16.msra.mxu0 %v2430_v10  ;;  %v732_v4 = vpop.permute.xlu0 %731 }
 0x1ff   :  { %v2434_v13 = vpack.c.bf16 %v2626_v11, %v2628_v12  ;;  %v737_v1 = vpop.permute.xlu1 %736 }
 0x201   :  { %v2630_v14 = vpop.eup %2629  ;;  %2435 = vmatprep.subr.bf16.mxu0 %v2434_v13 }
 0x202   :  { %v2632_v15 = vpop.eup %2631  ;;  %2437 = vmatpush3.bf16.msra.mxu0 %v2434_v13 }
 0x203   :  { %v2438_v16 = vpack.c.bf16 %v2630_v14, %v2632_v15  ;;  %v747_v15 = vpop.permute.xlu1 %746 }
 0x205   :  { %v2634_v17 = vpop.eup %2633  ;;  %2439 = vmatprep.subr.bf16.mxu0 %v2438_v16 }
 0x206   :  { %v2636_v18 = vpop.eup %2635  ;;  %2441 = vmatpush3.bf16.msra.mxu0 %v2438_v16 }
 0x207   :  { %v2442_v19 = vpack.c.bf16 %v2634_v17, %v2636_v18  ;;  %v742_v17 = vpop.permute.xlu0 %741 }
 0x209   :  { %2443 = vmatprep.subr.bf16.mxu0 %v2442_v19 }
 0x20a   :  { %2445 = vmatpush3.bf16.msra.mxu0 %v2442_v19 }
 0x20d   :  { %2156 = vmatmul.mubr.f32.vlgmr.msra.gmra.mrb[16].mxu0 %v648_v20 }
 0x20e   :  { %2158 = vmatprep.mubr.f32.mxu0 %v649_v21 }
 0x211   :  { %2159 = vmatmul.mubr.f32.gmra.mrb[18].mxu0 %v650_v22 }
 0x212   :  { %2161 = vmatprep.mubr.f32.mxu0 %v651_v23 }
 0x215   :  { %2162 = vmatmul.mubr.f32.gmra.mrb[20].mxu0 %v652_v24 }
 0x216   :  { %2164 = vmatprep.mubr.f32.mxu0 %v653_v25 }
 0x219   :  { %2165 = vmatmul.mubr.f32.gmra.mrb[22].mxu0 %v654_v26  ;;  %v757_v26 = vpop.permute.xlu1 %756 }
 0x21a   :  { %2167 = vmatprep.mubr.f32.mxu0 %v655_v27 }
 0x21d   :  { %2168 = vmatmul.mubr.f32.gmra.mrb[24].mxu0 %v656_v28 }
 0x21e   :  { %2170 = vmatprep.mubr.f32.mxu0 %v657_v29  ;;  %v752_v29 = vpop.permute.xlu0 %751 }
 0x221   :  { %2171 = vmatmul.mubr.f32.gmra.mrb[26].mxu0 %v658_v30 }
 0x222   :  { %2173 = vmatprep.mubr.f32.mxu0 %v659_v31 }
 0x225   :  { %2174 = vmatmul.mubr.f32.gmra.mrb[28].mxu0 %v660_v32 }
 0x226   :  { %2176 = vmatprep.mubr.f32.mxu0 %v661_v33 }
 0x229   :  { %2177 = vmatmul.mubr.f32.gmra.mrb[30].mxu0 %v662_v34 }
 0x2e0   :  { %v2157_v42 = vpop.f32.mrb[16].mxu0 }
 0x2e1   :  { %v831_v43 = vadd.f32 %v2157_v42, %v687_v36  ;;  %v825_v44 = vpop.f32.mrb[17].mxu0 }
 0x2e2   :  { %v826_v45 = vadd.f32 %v825_v44, %v682_v37  ;;  %v921_v44 = vld [vmem:[%s3502_s7 + $0x8] sm:$0xff] }
 0x2e3   :  { %2637 = vtanh.f32 %v831_v43 }
 0x2e4   :  { %2639 = vtanh.f32 %v826_v45  ;;  %v2160_v47 = vpop.f32.mrb[18].mxu0  ;;  %v922_v45 = vld [vmem:[%s3502_s7 + $0x10] sm:$0xff] }
 0x2e5   :  { %v841_v49 = vadd.f32 %v2160_v47, %v697_v38  ;;  %v835_v50 = vpop.f32.mrb[19].mxu0  ;;  %v924_v47 = vld [vmem:[%s3502_s7 + $0x20] sm:$0xff] }
 0x2e6   :  { %v836_v51 = vadd.f32 %v835_v50, %v692_v39  ;;  %v927_v50 = vld [vmem:[%s3502_s7 + $0x38] sm:$0xff] }
 0x2e7   :  { %2641 = vtanh.f32 %v841_v49  ;;  %v926_v49 = vld [vmem:[%s3502_s7 + $0x30] sm:$0xff] }
 0x2e8   :  { %2643 = vtanh.f32 %v836_v51  ;;  %v2163_v52 = vpop.f32.mrb[20].mxu0  ;;  %v928_v51 = vld [vmem:[%s3502_s7 + $0x40] sm:$0xff] }
 0x2e9   :  { %v851_v53 = vadd.f32 %v2163_v52, %v707_v40  ;;  %v845_v54 = vpop.f32.mrb[21].mxu0  ;;  %v929_v52 = vld [vmem:[%s3502_s7 + $0x48] sm:$0xff] }
 0x2ea   :  { %v846_v56 = vadd.f32 %v845_v54, %v702_v41  ;;  %v931_v54 = vld [vmem:[%s3502_s7 + $0x58] sm:$0xff] }
 0x2eb   :  { %2645 = vtanh.f32 %v851_v53  ;;  %v930_v53 = vld [vmem:[%s3502_s7 + $0x50] sm:$0xff] }
 0x2ec   :  { %2647 = vtanh.f32 %v846_v56  ;;  %v2166_v58 = vpop.f32.mrb[22].mxu0  ;;  %v933_v56 = vld [vmem:[%s3502_s7 + $0x68] sm:$0xff] }
 0x2ed   :  { %v2638_v59 = vpop.eup %2637  ;;  %v861_v60 = vadd.f32 %v2166_v58, %v717_v46  ;;  %v855_v61 = vpop.f32.mrb[23].mxu0  ;;  %v923_v46 = vld [vmem:[%s3502_s7 + $0x18] sm:$0xff] }
 0x2ee   :  { %v2640_v62 = vpop.eup %2639  ;;  %v856_v63 = vadd.f32 %v855_v61, %v712_v48  ;;  %v925_v48 = vld [vmem:[%s3502_s7 + $0x28] sm:$0xff]  ;;  %v935_v58 = vld [vmem:[%s3502_s7 + $0x78] sm:$0xff]  ;;  %v955_v61 = vpop.permute.xlu0 %954 }
 0x2ef   :  { %2649 = vtanh.f32 %v861_v60  ;;  %v2446_v0 = vpack.c.bf16 %v2638_v59, %v2640_v62  ;;  %v1193_v59 = vld [vmem:[%s3504_s9] sm:$0xff]  ;;  %v960_v60 = vpop.permute.xlu1 %959 }
 0x2f0   :  { %2651 = vtanh.f32 %v856_v63  ;;  %v2169_v2 = vpop.f32.mrb[24].mxu0  ;;  %2267 = vmatprep.mubr.f32.mxu0 %v1193_v59 }
 0x2f1   :  { %v2642_v3 = vpop.eup %2641  ;;  %v871_v5 = vadd.f32 %v2169_v2, %v727_v55  ;;  %v865_v6 = vpop.f32.mrb[25].mxu0  ;;  %2447 = vmatprep.subr.bf16.mxu1 %v2446_v0  ;;  %v932_v55 = vld [vmem:[%s3502_s7 + $0x60] sm:$0xff] }
 0x2f2   :  { %v2644_v7 = vpop.eup %2643  ;;  %v866_v8 = vadd.f32 %v865_v6, %v722_v57  ;;  %2449 = vmatpush3.bf16.msra.mxu1 %v2446_v0  ;;  %v934_v57 = vld [vmem:[%s3502_s7 + $0x70] sm:$0xff]  ;;  %v965_v63 = vpop.permute.xlu0 %964 }
 0x2f3   :  { %2653 = vtanh.f32 %v871_v5  ;;  %v2450_v9 = vpack.c.bf16 %v2642_v3, %v2644_v7  ;;  %v970_v62 = vpop.permute.xlu1 %969 }
 0x2f4   :  { %2655 = vtanh.f32 %v866_v8  ;;  %v2172_v10 = vpop.f32.mrb[26].mxu0 }
 0x2f5   :  { %v2646_v11 = vpop.eup %2645  ;;  %v881_v12 = vadd.f32 %v2172_v10, %v737_v1  ;;  %v875_v13 = vpop.f32.mrb[27].mxu0  ;;  %2451 = vmatprep.subr.bf16.mxu1 %v2450_v9 }
 0x2f6   :  { %v2648_v14 = vpop.eup %2647  ;;  %v876_v16 = vadd.f32 %v875_v13, %v732_v4  ;;  %2453 = vmatpush3.bf16.msra.mxu1 %v2450_v9  ;;  %v975_v1 = vpop.permute.xlu0 %974 }
 0x2f7   :  { %2657 = vtanh.f32 %v881_v12  ;;  %v2454_v18 = vpack.c.bf16 %v2646_v11, %v2648_v14  ;;  %v980_v0 = vpop.permute.xlu1 %979 }
 0x2f8   :  { %2659 = vtanh.f32 %v876_v16  ;;  %v2175_v19 = vpop.f32.mrb[28].mxu0 }
 0x2f9   :  { %v2650_v20 = vpop.eup %2649  ;;  %v891_v21 = vadd.f32 %v2175_v19, %v747_v15  ;;  %v885_v22 = vpop.f32.mrb[29].mxu0  ;;  %2455 = vmatprep.subr.bf16.mxu1 %v2454_v18 }
 0x2fa   :  { %v2652_v23 = vpop.eup %2651  ;;  %v886_v24 = vadd.f32 %v885_v22, %v742_v17  ;;  %2457 = vmatpush3.bf16.msra.mxu1 %v2454_v18  ;;  %v985_v8 = vpop.permute.xlu0 %984 }
 0x2fb   :  { %2661 = vtanh.f32 %v891_v21  ;;  %v2458_v25 = vpack.c.bf16 %v2650_v20, %v2652_v23  ;;  %v990_v6 = vpop.permute.xlu1 %989 }
 0x2fc   :  { %2663 = vtanh.f32 %v886_v24  ;;  %v2178_v27 = vpop.f32.mrb[30].mxu0 }
 0x2fd   :  { %v2654_v28 = vpop.eup %2653  ;;  %v901_v30 = vadd.f32 %v2178_v27, %v757_v26  ;;  %v895_v31 = vpop.f32.mrb[31].mxu0  ;;  %2459 = vmatprep.subr.bf16.mxu1 %v2458_v25 }
 0x2fe   :  { %v2656_v32 = vpop.eup %2655  ;;  %v896_v33 = vadd.f32 %v895_v31, %v752_v29  ;;  %2461 = vmatpush3.bf16.msra.mxu1 %v2458_v25  ;;  %v995_v17 = vpop.permute.xlu0 %994 }
 0x2ff   :  { %2665 = vtanh.f32 %v901_v30  ;;  %v2462_v34 = vpack.c.bf16 %v2654_v28, %v2656_v32  ;;  %v1000_v15 = vpop.permute.xlu1 %999 }
 0x300   :  { %2667 = vtanh.f32 %v896_v33 }
 0x301   :  { %v2658_v35 = vpop.eup %2657  ;;  %2463 = vmatprep.subr.bf16.mxu1 %v2462_v34 }
 0x302   :  { %v2660_v36 = vpop.eup %2659  ;;  %2465 = vmatpush3.bf16.msra.mxu1 %v2462_v34  ;;  %v1005_v28 = vpop.permute.xlu0 %1004 }
 0x303   :  { %v2466_v37 = vpack.c.bf16 %v2658_v35, %v2660_v36  ;;  %v1010_v25 = vpop.permute.xlu1 %1009 }
 0x305   :  { %v2662_v38 = vpop.eup %2661  ;;  %2467 = vmatprep.subr.bf16.mxu1 %v2466_v37 }
 0x306   :  { %v2664_v39 = vpop.eup %2663  ;;  %2469 = vmatpush3.bf16.msra.mxu1 %v2466_v37 }
 0x307   :  { %v2470_v40 = vpack.c.bf16 %v2662_v38, %v2664_v39  ;;  %v1020_v39 = vpop.permute.xlu1 %1019 }
 0x309   :  { %v2666_v41 = vpop.eup %2665  ;;  %2471 = vmatprep.subr.bf16.mxu1 %v2470_v40 }
 0x30a   :  { %v2668_v42 = vpop.eup %2667  ;;  %2473 = vmatpush3.bf16.msra.mxu1 %v2470_v40 }
 0x30b   :  { %v2474_v43 = vpack.c.bf16 %v2666_v41, %v2668_v42  ;;  %v1015_v41 = vpop.permute.xlu0 %1014 }
 0x30d   :  { %2475 = vmatprep.subr.bf16.mxu1 %v2474_v43 }
 0x30e   :  { %2477 = vmatpush3.bf16.msra.mxu1 %v2474_v43 }
 0x311   :  { %2212 = vmatmul.mubr.f32.vlgmr.msra.gmra.mrb[16].mxu1 %v921_v44 }
 0x312   :  { %2214 = vmatprep.mubr.f32.mxu1 %v922_v45 }
 0x315   :  { %2215 = vmatmul.mubr.f32.gmra.mrb[18].mxu1 %v923_v46 }
 0x316   :  { %2217 = vmatprep.mubr.f32.mxu1 %v924_v47 }
 0x319   :  { %2218 = vmatmul.mubr.f32.gmra.mrb[20].mxu1 %v925_v48 }
 0x31a   :  { %2220 = vmatprep.mubr.f32.mxu1 %v926_v49 }
 0x31d   :  { %2221 = vmatmul.mubr.f32.gmra.mrb[22].mxu1 %v927_v50  ;;  %v1030_v50 = vpop.permute.xlu1 %1029 }
 0x31e   :  { %2223 = vmatprep.mubr.f32.mxu1 %v928_v51 }
 0x321   :  { %2224 = vmatmul.mubr.f32.gmra.mrb[24].mxu1 %v929_v52 }
 0x322   :  { %2226 = vmatprep.mubr.f32.mxu1 %v930_v53  ;;  %v1025_v53 = vpop.permute.xlu0 %1024 }
 0x325   :  { %2227 = vmatmul.mubr.f32.gmra.mrb[26].mxu1 %v931_v54 }
 0x326   :  { %2229 = vmatprep.mubr.f32.mxu1 %v932_v55 }
 0x329   :  { %2230 = vmatmul.mubr.f32.gmra.mrb[28].mxu1 %v933_v56 }
 0x32a   :  { %2232 = vmatprep.mubr.f32.mxu1 %v934_v57 }
 0x32d   :  { %2233 = vmatmul.mubr.f32.gmra.mrb[30].mxu1 %v935_v58 }
 0x3e4   :  { %v2213_v2 = vpop.f32.mrb[16].mxu1 }
 0x3e5   :  { %v1104_v3 = vadd.f32 %v2213_v2, %v960_v60  ;;  %v1098_v4 = vpop.f32.mrb[17].mxu1 }
 0x3e6   :  { %v1099_v5 = vadd.f32 %v1098_v4, %v955_v61  ;;  %v1194_v4 = vld [vmem:[%s3504_s9 + $0x8] sm:$0xff] }
 0x3e7   :  { %2669 = vtanh.f32 %v1104_v3 }
 0x3e8   :  { %2671 = vtanh.f32 %v1099_v5  ;;  %v2216_v7 = vpop.f32.mrb[18].mxu1  ;;  %v1195_v5 = vld [vmem:[%s3504_s9 + $0x10] sm:$0xff] }
 0x3e9   :  { %v1114_v9 = vadd.f32 %v2216_v7, %v970_v62  ;;  %v1108_v10 = vpop.f32.mrb[19].mxu1  ;;  %v1197_v7 = vld [vmem:[%s3504_s9 + $0x20] sm:$0xff] }
 0x3ea   :  { %v1109_v11 = vadd.f32 %v1108_v10, %v965_v63  ;;  %v1200_v10 = vld [vmem:[%s3504_s9 + $0x38] sm:$0xff] }
 0x3eb   :  { %2673 = vtanh.f32 %v1114_v9  ;;  %v1199_v9 = vld [vmem:[%s3504_s9 + $0x30] sm:$0xff] }
 0x3ec   :  { %2675 = vtanh.f32 %v1109_v11  ;;  %v2219_v12 = vpop.f32.mrb[20].mxu1  ;;  %v1201_v11 = vld [vmem:[%s3504_s9 + $0x40] sm:$0xff] }
 0x3ed   :  { %v1124_v13 = vadd.f32 %v2219_v12, %v980_v0  ;;  %v1118_v14 = vpop.f32.mrb[21].mxu1  ;;  %v1202_v12 = vld [vmem:[%s3504_s9 + $0x48] sm:$0xff] }
 0x3ee   :  { %v1119_v16 = vadd.f32 %v1118_v14, %v975_v1  ;;  %v1204_v14 = vld [vmem:[%s3504_s9 + $0x58] sm:$0xff] }
 0x3ef   :  { %2677 = vtanh.f32 %v1124_v13  ;;  %v1203_v13 = vld [vmem:[%s3504_s9 + $0x50] sm:$0xff] }
 0x3f0   :  { %2679 = vtanh.f32 %v1119_v16  ;;  %v2222_v18 = vpop.f32.mrb[22].mxu1  ;;  %v1206_v16 = vld [vmem:[%s3504_s9 + $0x68] sm:$0xff] }
 0x3f1   :  { %v2670_v19 = vpop.eup %2669  ;;  %v1134_v20 = vadd.f32 %v2222_v18, %v990_v6  ;;  %v1128_v21 = vpop.f32.mrb[23].mxu1  ;;  %v1196_v6 = vld [vmem:[%s3504_s9 + $0x18] sm:$0xff] }
 0x3f2   :  { %v2672_v22 = vpop.eup %2671  ;;  %v1129_v23 = vadd.f32 %v1128_v21, %v985_v8  ;;  %v1198_v8 = vld [vmem:[%s3504_s9 + $0x28] sm:$0xff]  ;;  %v1208_v18 = vld [vmem:[%s3504_s9 + $0x78] sm:$0xff]  ;;  %v1228_v21 = vpop.permute.xlu0 %1227 }
 0x3f3   :  { %2681 = vtanh.f32 %v1134_v20  ;;  %v2478_v24 = vpack.c.bf16 %v2670_v19, %v2672_v22  ;;  %v1466_v19 = vld [vmem:[%s3506_s11] sm:$0xff]  ;;  %v1233_v20 = vpop.permute.xlu1 %1232 }
 0x3f4   :  { %2683 = vtanh.f32 %v1129_v23  ;;  %v2225_v26 = vpop.f32.mrb[24].mxu1  ;;  %2323 = vmatprep.mubr.f32.mxu1 %v1466_v19 }
 0x3f5   :  { %v2674_v27 = vpop.eup %2673  ;;  %v1144_v29 = vadd.f32 %v2225_v26, %v1000_v15  ;;  %v1138_v30 = vpop.f32.mrb[25].mxu1  ;;  %2479 = vmatprep.subr.bf16.mxu0 %v2478_v24  ;;  %v1205_v15 = vld [vmem:[%s3504_s9 + $0x60] sm:$0xff] }
 0x3f6   :  { %v2676_v31 = vpop.eup %2675  ;;  %v1139_v32 = vadd.f32 %v1138_v30, %v995_v17  ;;  %2481 = vmatpush3.bf16.msra.mxu0 %v2478_v24  ;;  %v1207_v17 = vld [vmem:[%s3504_s9 + $0x70] sm:$0xff]  ;;  %v1238_v23 = vpop.permute.xlu0 %1237 }
 0x3f7   :  { %2685 = vtanh.f32 %v1144_v29  ;;  %v2482_v33 = vpack.c.bf16 %v2674_v27, %v2676_v31  ;;  %v1243_v22 = vpop.permute.xlu1 %1242 }
 0x3f8   :  { %2687 = vtanh.f32 %v1139_v32  ;;  %v2228_v34 = vpop.f32.mrb[26].mxu1 }
 0x3f9   :  { %v2678_v35 = vpop.eup %2677  ;;  %v1154_v36 = vadd.f32 %v2228_v34, %v1010_v25  ;;  %v1148_v37 = vpop.f32.mrb[27].mxu1  ;;  %2483 = vmatprep.subr.bf16.mxu0 %v2482_v33 }
 0x3fa   :  { %v2680_v38 = vpop.eup %2679  ;;  %v1149_v40 = vadd.f32 %v1148_v37, %v1005_v28  ;;  %2485 = vmatpush3.bf16.msra.mxu0 %v2482_v33  ;;  %v1248_v25 = vpop.permute.xlu0 %1247 }
 0x3fb   :  { %2689 = vtanh.f32 %v1154_v36  ;;  %v2486_v42 = vpack.c.bf16 %v2678_v35, %v2680_v38  ;;  %v1253_v24 = vpop.permute.xlu1 %1252 }
 0x3fc   :  { %2691 = vtanh.f32 %v1149_v40  ;;  %v2231_v43 = vpop.f32.mrb[28].mxu1 }
 0x3fd   :  { %v2682_v44 = vpop.eup %2681  ;;  %v1164_v45 = vadd.f32 %v2231_v43, %v1020_v39  ;;  %v1158_v46 = vpop.f32.mrb[29].mxu1  ;;  %2487 = vmatprep.subr.bf16.mxu0 %v2486_v42 }
 0x3fe   :  { %v2684_v47 = vpop.eup %2683  ;;  %v1159_v48 = vadd.f32 %v1158_v46, %v1015_v41  ;;  %2489 = vmatpush3.bf16.msra.mxu0 %v2486_v42  ;;  %v1258_v32 = vpop.permute.xlu0 %1257 }
 0x3ff   :  { %2693 = vtanh.f32 %v1164_v45  ;;  %v2490_v49 = vpack.c.bf16 %v2682_v44, %v2684_v47  ;;  %v1263_v30 = vpop.permute.xlu1 %1262 }
 0x400   :  { %2695 = vtanh.f32 %v1159_v48  ;;  %v2234_v51 = vpop.f32.mrb[30].mxu1 }
 0x401   :  { %v2686_v52 = vpop.eup %2685  ;;  %v1174_v54 = vadd.f32 %v2234_v51, %v1030_v50  ;;  %v1168_v55 = vpop.f32.mrb[31].mxu1  ;;  %2491 = vmatprep.subr.bf16.mxu0 %v2490_v49 }
 0x402   :  { %v2688_v56 = vpop.eup %2687  ;;  %v1169_v57 = vadd.f32 %v1168_v55, %v1025_v53  ;;  %2493 = vmatpush3.bf16.msra.mxu0 %v2490_v49  ;;  %v1268_v41 = vpop.permute.xlu0 %1267 }
 0x403   :  { %2697 = vtanh.f32 %v1174_v54  ;;  %v2494_v58 = vpack.c.bf16 %v2686_v52, %v2688_v56  ;;  %v1273_v39 = vpop.permute.xlu1 %1272 }
 0x404   :  { %2699 = vtanh.f32 %v1169_v57 }
 0x405   :  { %v2690_v59 = vpop.eup %2689  ;;  %2495 = vmatprep.subr.bf16.mxu0 %v2494_v58 }
 0x406   :  { %v2692_v60 = vpop.eup %2691  ;;  %2497 = vmatpush3.bf16.msra.mxu0 %v2494_v58  ;;  %v1278_v52 = vpop.permute.xlu0 %1277 }
 0x407   :  { %v2498_v61 = vpack.c.bf16 %v2690_v59, %v2692_v60  ;;  %v1283_v49 = vpop.permute.xlu1 %1282 }
 0x409   :  { %v2694_v62 = vpop.eup %2693  ;;  %2499 = vmatprep.subr.bf16.mxu0 %v2498_v61 }
 0x40a   :  { %v2696_v63 = vpop.eup %2695  ;;  %2501 = vmatpush3.bf16.msra.mxu0 %v2498_v61 }
 0x40b   :  { %v2502_v0 = vpack.c.bf16 %v2694_v62, %v2696_v63  ;;  %v1293_v63 = vpop.permute.xlu1 %1292 }
 0x40d   :  { %v2698_v1 = vpop.eup %2697  ;;  %2503 = vmatprep.subr.bf16.mxu0 %v2502_v0 }
 0x40e   :  { %v2700_v2 = vpop.eup %2699  ;;  %2505 = vmatpush3.bf16.msra.mxu0 %v2502_v0 }
 0x40f   :  { %v2506_v3 = vpack.c.bf16 %v2698_v1, %v2700_v2  ;;  %v1288_v1 = vpop.permute.xlu0 %1287 }
 0x411   :  { %2507 = vmatprep.subr.bf16.mxu0 %v2506_v3 }
 0x412   :  { %2509 = vmatpush3.bf16.msra.mxu0 %v2506_v3 }
 0x415   :  { %2268 = vmatmul.mubr.f32.vlgmr.msra.gmra.mrb[32].mxu0 %v1194_v4 }
 0x416   :  { %2270 = vmatprep.mubr.f32.mxu0 %v1195_v5 }
 0x419   :  { %2271 = vmatmul.mubr.f32.gmra.mrb[34].mxu0 %v1196_v6 }
 0x41a   :  { %2273 = vmatprep.mubr.f32.mxu0 %v1197_v7 }
 0x41d   :  { %2274 = vmatmul.mubr.f32.gmra.mrb[36].mxu0 %v1198_v8 }
 0x41e   :  { %2276 = vmatprep.mubr.f32.mxu0 %v1199_v9 }
 0x421   :  { %2277 = vmatmul.mubr.f32.gmra.mrb[38].mxu0 %v1200_v10  ;;  %v1303_v10 = vpop.permute.xlu1 %1302 }
 0x422   :  { %2279 = vmatprep.mubr.f32.mxu0 %v1201_v11 }
 0x425   :  { %2280 = vmatmul.mubr.f32.gmra.mrb[40].mxu0 %v1202_v12 }
 0x426   :  { %2282 = vmatprep.mubr.f32.mxu0 %v1203_v13  ;;  %v1298_v13 = vpop.permute.xlu0 %1297 }
 0x429   :  { %2283 = vmatmul.mubr.f32.gmra.mrb[42].mxu0 %v1204_v14 }
 0x42a   :  { %2285 = vmatprep.mubr.f32.mxu0 %v1205_v15 }
 0x42d   :  { %2286 = vmatmul.mubr.f32.gmra.mrb[44].mxu0 %v1206_v16 }
 0x42e   :  { %2288 = vmatprep.mubr.f32.mxu0 %v1207_v17 }
 0x431   :  { %2289 = vmatmul.mubr.f32.gmra.mrb[46].mxu0 %v1208_v18 }
 0x4e8   :  { %v2269_v26 = vpop.f32.mrb[32].mxu0 }
 0x4e9   :  { %v1377_v27 = vadd.f32 %v2269_v26, %v1233_v20  ;;  %v1371_v28 = vpop.f32.mrb[33].mxu0 }
 0x4ea   :  { %v1372_v29 = vadd.f32 %v1371_v28, %v1228_v21  ;;  %v1467_v28 = vld [vmem:[%s3506_s11 + $0x8] sm:$0xff] }
 0x4eb   :  { %2701 = vtanh.f32 %v1377_v27 }
 0x4ec   :  { %2703 = vtanh.f32 %v1372_v29  ;;  %v2272_v31 = vpop.f32.mrb[34].mxu0  ;;  %v1468_v29 = vld [vmem:[%s3506_s11 + $0x10] sm:$0xff] }
 0x4ed   :  { %v1387_v33 = vadd.f32 %v2272_v31, %v1243_v22  ;;  %v1381_v34 = vpop.f32.mrb[35].mxu0  ;;  %v1470_v31 = vld [vmem:[%s3506_s11 + $0x20] sm:$0xff] }
 0x4ee   :  { %v1382_v35 = vadd.f32 %v1381_v34, %v1238_v23  ;;  %v1473_v34 = vld [vmem:[%s3506_s11 + $0x38] sm:$0xff] }
 0x4ef   :  { %2705 = vtanh.f32 %v1387_v33  ;;  %v1472_v33 = vld [vmem:[%s3506_s11 + $0x30] sm:$0xff] }
 0x4f0   :  { %2707 = vtanh.f32 %v1382_v35  ;;  %v2275_v36 = vpop.f32.mrb[36].mxu0  ;;  %v1474_v35 = vld [vmem:[%s3506_s11 + $0x40] sm:$0xff] }
 0x4f1   :  { %v1397_v37 = vadd.f32 %v2275_v36, %v1253_v24  ;;  %v1391_v38 = vpop.f32.mrb[37].mxu0  ;;  %v1475_v36 = vld [vmem:[%s3506_s11 + $0x48] sm:$0xff] }
 0x4f2   :  { %v1392_v40 = vadd.f32 %v1391_v38, %v1248_v25  ;;  %v1477_v38 = vld [vmem:[%s3506_s11 + $0x58] sm:$0xff] }
 0x4f3   :  { %2709 = vtanh.f32 %v1397_v37  ;;  %v1476_v37 = vld [vmem:[%s3506_s11 + $0x50] sm:$0xff] }
 0x4f4   :  { %2711 = vtanh.f32 %v1392_v40  ;;  %v2278_v42 = vpop.f32.mrb[38].mxu0  ;;  %v1479_v40 = vld [vmem:[%s3506_s11 + $0x68] sm:$0xff] }
 0x4f5   :  { %v2702_v43 = vpop.eup %2701  ;;  %v1407_v44 = vadd.f32 %v2278_v42, %v1263_v30  ;;  %v1401_v45 = vpop.f32.mrb[39].mxu0  ;;  %v1469_v30 = vld [vmem:[%s3506_s11 + $0x18] sm:$0xff] }
 0x4f6   :  { %v2704_v46 = vpop.eup %2703  ;;  %v1402_v47 = vadd.f32 %v1401_v45, %v1258_v32  ;;  %v1471_v32 = vld [vmem:[%s3506_s11 + $0x28] sm:$0xff]  ;;  %v1481_v42 = vld [vmem:[%s3506_s11 + $0x78] sm:$0xff]  ;;  %v1506_v45 = vpop.permute.xlu1 %1505 }
 0x4f7   :  { %2713 = vtanh.f32 %v1407_v44  ;;  %v2510_v48 = vpack.c.bf16 %v2702_v43, %v2704_v46  ;;  %v2790_v43 = vmov 0.0|0.0   ;;  %v2792_v44 = vmov 0.0   ;;  %v1501_v46 = vpop.permute.xlu0 %1500 }
 0x4f8   :  { %2715 = vtanh.f32 %v1402_v47  ;;  %v2281_v50 = vpop.f32.mrb[40].mxu0  ;;  %2542 = vmatprep.subr.bf16.mxu0 %v2790_v43  ;;  %2379 = vmatprep.mubr.msk.f32.mxu0 %vm2791_vm1, %v2792_v44 }
 0x4f9   :  { %v2706_v51 = vpop.eup %2705  ;;  %v1417_v53 = vadd.f32 %v2281_v50, %v1273_v39  ;;  %v1411_v54 = vpop.f32.mrb[41].mxu0  ;;  %2511 = vmatprep.subr.bf16.mxu1 %v2510_v48  ;;  %v1478_v39 = vld [vmem:[%s3506_s11 + $0x60] sm:$0xff] }
 0x4fa   :  { %v2708_v55 = vpop.eup %2707  ;;  %v1412_v56 = vadd.f32 %v1411_v54, %v1268_v41  ;;  %2513 = vmatpush3.bf16.msra.mxu1 %v2510_v48  ;;  %v1480_v41 = vld [vmem:[%s3506_s11 + $0x70] sm:$0xff]  ;;  %v1516_v47 = vpop.permute.xlu1 %1515 }
 0x4fb   :  { %2717 = vtanh.f32 %v1417_v53  ;;  %v2514_v57 = vpack.c.bf16 %v2706_v51, %v2708_v55  ;;  %v1511_v48 = vpop.permute.xlu0 %1510 }
 0x4fc   :  { %2719 = vtanh.f32 %v1412_v56  ;;  %v2284_v58 = vpop.f32.mrb[42].mxu0 }
 0x4fd   :  { %v2710_v59 = vpop.eup %2709  ;;  %v1427_v60 = vadd.f32 %v2284_v58, %v1283_v49  ;;  %v1421_v61 = vpop.f32.mrb[43].mxu0  ;;  %2515 = vmatprep.subr.bf16.mxu1 %v2514_v57 }
 0x4fe   :  { %v2712_v62 = vpop.eup %2711  ;;  %v1422_v0 = vadd.f32 %v1421_v61, %v1278_v52  ;;  %2517 = vmatpush3.bf16.msra.mxu1 %v2514_v57  ;;  %v1526_v49 = vpop.permute.xlu1 %1525 }
 0x4ff   :  { %2721 = vtanh.f32 %v1427_v60  ;;  %v2518_v2 = vpack.c.bf16 %v2710_v59, %v2712_v62  ;;  %v1521_v50 = vpop.permute.xlu0 %1520 }
 0x500   :  { %2723 = vtanh.f32 %v1422_v0  ;;  %v2287_v3 = vpop.f32.mrb[44].mxu0 }
 0x501   :  { %v2714_v4 = vpop.eup %2713  ;;  %v1437_v5 = vadd.f32 %v2287_v3, %v1293_v63  ;;  %v1431_v6 = vpop.f32.mrb[45].mxu0  ;;  %2519 = vmatprep.subr.bf16.mxu1 %v2518_v2 }
 0x502   :  { %v2716_v7 = vpop.eup %2715  ;;  %v1432_v8 = vadd.f32 %v1431_v6, %v1288_v1  ;;  %2521 = vmatpush3.bf16.msra.mxu1 %v2518_v2  ;;  %v1536_v55 = vpop.permute.xlu1 %1535 }
 0x503   :  { %2725 = vtanh.f32 %v1437_v5  ;;  %v2522_v9 = vpack.c.bf16 %v2714_v4, %v2716_v7  ;;  %v1531_v57 = vpop.permute.xlu0 %1530 }
 0x504   :  { %2727 = vtanh.f32 %v1432_v8  ;;  %v2290_v11 = vpop.f32.mrb[46].mxu0 }
 0x505   :  { %v2718_v12 = vpop.eup %2717  ;;  %v1447_v14 = vadd.f32 %v2290_v11, %v1303_v10  ;;  %v1441_v15 = vpop.f32.mrb[47].mxu0  ;;  %2523 = vmatprep.subr.bf16.mxu1 %v2522_v9 }
 0x506   :  { %v2720_v16 = vpop.eup %2719  ;;  %v1442_v17 = vadd.f32 %v1441_v15, %v1298_v13  ;;  %2525 = vmatpush3.bf16.msra.mxu1 %v2522_v9  ;;  %v1546_v0 = vpop.permute.xlu1 %1545 }
 0x507   :  { %2729 = vtanh.f32 %v1447_v14  ;;  %v2526_v18 = vpack.c.bf16 %v2718_v12, %v2720_v16  ;;  %v1541_v2 = vpop.permute.xlu0 %1540 }
 0x508   :  { %2731 = vtanh.f32 %v1442_v17 }
 0x509   :  { %v2722_v19 = vpop.eup %2721  ;;  %2527 = vmatprep.subr.bf16.mxu1 %v2526_v18 }
 0x50a   :  { %v2724_v20 = vpop.eup %2723  ;;  %2529 = vmatpush3.bf16.msra.mxu1 %v2526_v18  ;;  %v1556_v10 = vpop.permute.xlu1 %1555 }
 0x50b   :  { %v2530_v21 = vpack.c.bf16 %v2722_v19, %v2724_v20  ;;  %v1551_v13 = vpop.permute.xlu0 %1550 }
 0x50d   :  { %v2726_v22 = vpop.eup %2725  ;;  %2531 = vmatprep.subr.bf16.mxu1 %v2530_v21 }
 0x50e   :  { %v2728_v23 = vpop.eup %2727  ;;  %2533 = vmatpush3.bf16.msra.mxu1 %v2530_v21 }
 0x50f   :  { %v2534_v24 = vpack.c.bf16 %v2726_v22, %v2728_v23 }
 0x511   :  { %v2730_v25 = vpop.eup %2729  ;;  %2535 = vmatprep.subr.bf16.mxu1 %v2534_v24 }
 0x512   :  { %v2732_v26 = vpop.eup %2731  ;;  %2537 = vmatpush3.bf16.msra.mxu1 %v2534_v24  ;;  %v1566_v24 = vpop.permute.xlu1 %1565 }
 0x513   :  { %v2538_v27 = vpack.c.bf16 %v2730_v25, %v2732_v26  ;;  %v1561_v26 = vpop.permute.xlu0 %1560 }
 0x515   :  { %2539 = vmatprep.subr.bf16.mxu1 %v2538_v27 }
 0x516   :  { %2541 = vmatpush3.bf16.msra.mxu1 %v2538_v27 }
 0x519   :  { %2324 = vmatmul.mubr.f32.vlgmr.msra.gmra.mrb[32].mxu1 %v1467_v28 }
 0x51a   :  { %2326 = vmatprep.mubr.f32.mxu1 %v1468_v29 }
 0x51d   :  { %2327 = vmatmul.mubr.f32.gmra.mrb[34].mxu1 %v1469_v30 }
 0x51e   :  { %2329 = vmatprep.mubr.f32.mxu1 %v1470_v31 }
 0x521   :  { %2330 = vmatmul.mubr.f32.gmra.mrb[36].mxu1 %v1471_v32 }
 0x522   :  { %2332 = vmatprep.mubr.f32.mxu1 %v1472_v33 }
 0x525   :  { %2333 = vmatmul.mubr.f32.gmra.mrb[38].mxu1 %v1473_v34 }
 0x526   :  { %2335 = vmatprep.mubr.f32.mxu1 %v1474_v35  ;;  %v1576_v35 = vpop.permute.xlu1 %1575 }
 0x529   :  { %2336 = vmatmul.mubr.f32.gmra.mrb[40].mxu1 %v1475_v36 }
 0x52a   :  { %2338 = vmatprep.mubr.f32.mxu1 %v1476_v37 }
 0x52d   :  { %2339 = vmatmul.mubr.f32.gmra.mrb[42].mxu1 %v1477_v38  ;;  %v1571_v38 = vpop.permute.xlu0 %1570 }
 0x52e   :  { %2341 = vmatprep.mubr.f32.mxu1 %v1478_v39 }
 0x531   :  { %2342 = vmatmul.mubr.f32.gmra.mrb[44].mxu1 %v1479_v40 }
 0x532   :  { %2344 = vmatprep.mubr.f32.mxu1 %v1480_v41 }
 0x535   :  { %2345 = vmatmul.mubr.f32.gmra.mrb[46].mxu1 %v1481_v42 }
 0x5ec   :  { %v2325_v51 = vpop.f32.mrb[32].mxu1 }
 0x5ed   :  { %v1650_v52 = vadd.f32 %v2325_v51, %v1506_v45  ;;  %v1644_v53 = vpop.f32.mrb[33].mxu1 }
 0x5ee   :  { %v1645_v54 = vadd.f32 %v1644_v53, %v1501_v46 }
 0x5ef   :  { %2733 = vtanh.f32 %v1650_v52 }
 0x5f0   :  { %2735 = vtanh.f32 %v1645_v54  ;;  %v2328_v56 = vpop.f32.mrb[34].mxu1  ;;  %v1739_v54 = vld [vmem:[%s3508_s13] sm:$0xff] }
 0x5f1   :  { %v1660_v58 = vadd.f32 %v2328_v56, %v1516_v47  ;;  %v1654_v59 = vpop.f32.mrb[35].mxu1 }
 0x5f2   :  { %v1655_v60 = vadd.f32 %v1654_v59, %v1511_v48 }
 0x5f3   :  { %2737 = vtanh.f32 %v1660_v58 }
 0x5f4   :  { %2739 = vtanh.f32 %v1655_v60  ;;  %v2331_v61 = vpop.f32.mrb[36].mxu1 }
 0x5f5   :  { %v1670_v62 = vadd.f32 %v2331_v61, %v1526_v49  ;;  %v1664_v63 = vpop.f32.mrb[37].mxu1 }
 0x5f6   :  { %v1665_v1 = vadd.f32 %v1664_v63, %v1521_v50 }
 0x5f7   :  { %2741 = vtanh.f32 %v1670_v62 }
 0x5f8   :  { %2743 = vtanh.f32 %v1665_v1  ;;  %v2334_v3 = vpop.f32.mrb[38].mxu1 }
 0x5f9   :  { %v2734_v4 = vpop.eup %2733  ;;  %v1680_v5 = vadd.f32 %v2334_v3, %v1536_v55  ;;  %v1674_v6 = vpop.f32.mrb[39].mxu1 }
 0x5fa   :  { %v2736_v7 = vpop.eup %2735  ;;  %v1675_v8 = vadd.f32 %v1674_v6, %v1531_v57  ;;  %v1744_v55 = vpop.permute.xlu0 %1743 }
 0x5fb   :  { %2745 = vtanh.f32 %v1680_v5  ;;  %v2543_v9 = vpack.c.bf16 %v2734_v4, %v2736_v7 }
 0x5fc   :  { %2747 = vtanh.f32 %v1675_v8  ;;  %v2337_v11 = vpop.f32.mrb[40].mxu1 }
 0x5fd   :  { %v2738_v12 = vpop.eup %2737  ;;  %v1690_v14 = vadd.f32 %v2337_v11, %v1546_v0  ;;  %v1684_v15 = vpop.f32.mrb[41].mxu1  ;;  %2544 = vmatpush3.bf16.msra.mxu0 %v2543_v9 }
 0x5fe   :  { %v2740_v16 = vpop.eup %2739  ;;  %v1685_v17 = vadd.f32 %v1684_v15, %v1541_v2  ;;  %2545 = vmatprep.subr.bf16.mxu0 %v2790_v43 }
 0x5ff   :  { %2749 = vtanh.f32 %v1690_v14  ;;  %v2546_v18 = vpack.c.bf16 %v2738_v12, %v2740_v16 }
 0x600   :  { %2751 = vtanh.f32 %v1685_v17  ;;  %v2340_v19 = vpop.f32.mrb[42].mxu1 }
 0x601   :  { %v2742_v20 = vpop.eup %2741  ;;  %v1700_v21 = vadd.f32 %v2340_v19, %v1556_v10  ;;  %v1694_v22 = vpop.f32.mrb[43].mxu1  ;;  %2547 = vmatpush3.bf16.msra.mxu0 %v2546_v18 }
 0x602   :  { %v2744_v23 = vpop.eup %2743  ;;  %v1695_v25 = vadd.f32 %v1694_v22, %v1551_v13  ;;  %2548 = vmatprep.subr.bf16.mxu0 %v2790_v43 }
 0x603   :  { %2753 = vtanh.f32 %v1700_v21  ;;  %v2549_v27 = vpack.c.bf16 %v2742_v20, %v2744_v23 }
 0x604   :  { %2755 = vtanh.f32 %v1695_v25  ;;  %v2343_v28 = vpop.f32.mrb[44].mxu1 }
 0x605   :  { %v2746_v29 = vpop.eup %2745  ;;  %v1710_v30 = vadd.f32 %v2343_v28, %v1566_v24  ;;  %v1704_v31 = vpop.f32.mrb[45].mxu1  ;;  %2550 = vmatpush3.bf16.msra.mxu0 %v2549_v27 }
 0x606   :  { %v2748_v32 = vpop.eup %2747  ;;  %v1705_v33 = vadd.f32 %v1704_v31, %v1561_v26  ;;  %2551 = vmatprep.subr.bf16.mxu0 %v2790_v43 }
 0x607   :  { %2757 = vtanh.f32 %v1710_v30  ;;  %v2552_v34 = vpack.c.bf16 %v2746_v29, %v2748_v32 }
 0x608   :  { %2759 = vtanh.f32 %v1705_v33  ;;  %v2346_v36 = vpop.f32.mrb[46].mxu1 }
 0x609   :  { %v2750_v37 = vpop.eup %2749  ;;  %v1720_v39 = vadd.f32 %v2346_v36, %v1576_v35  ;;  %v1714_v40 = vpop.f32.mrb[47].mxu1  ;;  %2553 = vmatpush3.bf16.msra.mxu0 %v2552_v34 }
 0x60a   :  { %v2752_v41 = vpop.eup %2751  ;;  %v1715_v42 = vadd.f32 %v1714_v40, %v1571_v38  ;;  %2554 = vmatprep.subr.bf16.mxu0 %v2790_v43 }
 0x60b   :  { %2761 = vtanh.f32 %v1720_v39  ;;  %v2555_v44 = vpack.c.bf16 %v2750_v37, %v2752_v41 }
 0x60c   :  { %2763 = vtanh.f32 %v1715_v42 }
 0x60d   :  { %v2754_v45 = vpop.eup %2753  ;;  %2556 = vmatpush3.bf16.msra.mxu0 %v2555_v44 }
 0x60e   :  { %v2756_v46 = vpop.eup %2755  ;;  %2557 = vmatprep.subr.bf16.mxu0 %v2790_v43 }
 0x60f   :  { %v2558_v47 = vpack.c.bf16 %v2754_v45, %v2756_v46 }
 0x611   :  { %v2758_v48 = vpop.eup %2757  ;;  %2559 = vmatpush3.bf16.msra.mxu0 %v2558_v47 }
 0x612   :  { %v2760_v49 = vpop.eup %2759  ;;  %2560 = vmatprep.subr.bf16.mxu0 %v2790_v43 }
 0x613   :  { %v2561_v50 = vpack.c.bf16 %v2758_v48, %v2760_v49 }
 0x615   :  { %v2762_v51 = vpop.eup %2761  ;;  %2562 = vmatpush3.bf16.msra.mxu0 %v2561_v50 }
 0x616   :  { %v2764_v52 = vpop.eup %2763  ;;  %2563 = vmatprep.subr.bf16.mxu0 %v2790_v43 }
 0x617   :  { %v2564_v53 = vpack.c.bf16 %v2762_v51, %v2764_v52 }
 0x619   :  { %2565 = vmatpush3.bf16.msra.mxu0 %v2564_v53 }
 0x61c   :  { %2380 = vmatmul.mubr.f32.vlgmr.msra.gmra.mrb[48].mxu0 %v1739_v54 }
 0x6ef   :  { %v1812_v56 = vpop.f32.mrb[48].mxu0 }
 0x6f0   :  { %v1813_v57 = vadd.f32 %v1812_v56, %v1744_v55  ;;  %v2381_v58 = vpop.f32.mrb[49].mxu0 }
 0x6f2   :  { %1816 = vst [vmem:[#allocation2] sm:$0xff] %v1813_v57 }
 0x6f3   :  { %2776 = shalt.err (!%p2773_p4)
}
 0x6f4   :  { %s2777_s13 = scalar_lea.hbm %s3510_s15, 128 }
 0x6f5   :  { %p2778_p5 = scmp.ne.s32.totalorder %s3510_s15, %s2777_s13  ;;  %p2781_p6 = scmp.lt.u32.totalorder %s2777_s13, %s3510_s15 }
 0x6f7   :  { %p2783_p7 = pnand %p2781_p6, %p2778_p5 }
 0x6f9   :  { %2786 = shalt.err (!%p2783_p7)
}
 0x6fa   :  { %1826 = dma.vmem_to_hbm [thread:$0]  %s1824_s4, 128, %s3510_s15, [#allocation3]  }
 0x6fb   :  { %2787 = dma.done.wait [#allocation3], 128  }
 0x6fc   :  { %2788 = vsyncadd [#allocation3], 4294967168 }
 0x6fd   :  { %1830 = vsyncpa [#allocation3], 1 }

</bundles_post_ra>
